<compile_context>
chip_gen: v6e
topology: v6e:2x2x1
jax: 0.10.0
libtpu: 0.0.40
codegen_flags: <defaults>
</compile_context>

<pallas_src>
import functools

import jax
import jax.numpy as jnp
from jax import lax
from jax.experimental import pallas as pl
from jax.experimental.pallas import tpu as pltpu


def _im2col_rows(img, H, W):
    """img: (C, H*W) channel-major image (f32).

    Returns (9*C, H*W) patches: row (ky*3 + kx)*C + c holds img[c] shifted by
    (ky-1, kx-1) with zero fill outside the image — i.e. the 3x3 'same' conv
    taps.  Shifts are static lane shifts (slice + concat) plus column masks;
    no padded scratch and no strided window copies.
    """
    C, HW = img.shape
    col = lax.broadcasted_iota(jnp.int32, (C, HW), 1) % W
    taps = []
    for ky in range(3):
        for kx in range(3):
            dy, dx = ky - 1, kx - 1
            s = dy * W + dx
            if s > 0:
                t = jnp.concatenate(
                    [img[:, s:], jnp.zeros((C, s), img.dtype)], axis=1)
            elif s < 0:
                t = jnp.concatenate(
                    [jnp.zeros((C, -s), img.dtype), img[:, :s]], axis=1)
            else:
                t = img
            if dx == 1:
                t = jnp.where(col != W - 1, t, jnp.zeros((), img.dtype))
            elif dx == -1:
                t = jnp.where(col != 0, t, jnp.zeros((), img.dtype))
            taps.append(t)
    return jnp.concatenate(taps, axis=0)


def _xgates_kernel(x_ref, wx9_ref, b_ref, out_ref, *, H, W):
    """x-path gates for one (batch, time) image; embarrassingly parallel.

    x_ref  : (Cin, H*W)     f32
    wx9_ref: (4*Ch, 9*Cin)  bf16  (stacked 3x3 taps along K)
    b_ref  : (4*Ch, 1)      f32
    out_ref: (4*Ch, H*W)    f32   (conv(x, Wx) + bias, channel-major)
    """
    patches = _im2col_rows(x_ref[...], H, W).astype(jnp.bfloat16)
    out_ref[...] = (
        jnp.dot(wx9_ref[...], patches, preferred_element_type=jnp.float32)
        + b_ref[...])


def _convlstm_step_kernel(xg_ref, wh9_ref, out_ref, h_scr, c_scr, *, H, W):
    """One recurrent step == grid point (b, t).

    xg_ref : (4*Ch, H*W)   precomputed x-gates (+bias) for this (b, t)
    wh9_ref: (4*Ch, 9*Ch)  stacked h-path conv weights, bf16
    out_ref: (Ch, H*W)     hidden-state output for this (b, t) (lane-dense)
    h_scr  : (Ch, H*W)     carried hidden state (f32)
    c_scr  : (Ch, H*W)     carried cell state (f32)
    """
    t = pl.program_id(1)

    @pl.when(t == 0)
    def _init():
        h_scr[...] = jnp.zeros_like(h_scr)
        c_scr[...] = jnp.zeros_like(c_scr)

    Ch = h_scr.shape[0]

    # Single fused K = 9*Ch matmul for the h-path conv of all 4 gates.
    patches = _im2col_rows(h_scr[...], H, W).astype(jnp.bfloat16)  # (9Ch, HW)
    gates = xg_ref[...] + jnp.dot(
        wh9_ref[...], patches, preferred_element_type=jnp.float32)  # (4Ch, HW)

    i_g = jax.nn.sigmoid(gates[0 * Ch:1 * Ch])
    f_g = jax.nn.sigmoid(gates[1 * Ch:2 * Ch])
    o_g = jax.nn.sigmoid(gates[2 * Ch:3 * Ch])
    g_g = jnp.tanh(gates[3 * Ch:4 * Ch])

    c_new = f_g * c_scr[...] + i_g * g_g
    h_new = o_g * jnp.tanh(c_new)

    c_scr[...] = c_new
    h_scr[...] = h_new
    out_ref[...] = h_new


@jax.jit
def convlstm_pallas(x_seq, weight, bias):
    """x_seq: (B, T, Cin, H, W); weight: (4*Ch, Cin+Ch, 3, 3); bias: (4*Ch,).

    Returns (B, T, Ch, H, W), matching the PyTorch module's output.
    """
    B, T, Cin, H, W = x_seq.shape
    Ch4 = weight.shape[0]
    Ch = Ch4 // 4
    HW = H * W

    # Split conv weight into x / h parts and stack the 3x3 taps along the
    # contraction axis: k = (ky*3 + kx)*C + c  (matches _im2col_rows).
    w = weight.astype(jnp.float32)
    wx9 = jnp.transpose(w[:, :Cin], (0, 2, 3, 1)).reshape(Ch4, 9 * Cin)
    wh9 = jnp.transpose(w[:, Cin:], (0, 2, 3, 1)).reshape(Ch4, 9 * Ch)
    wx9 = wx9.astype(jnp.bfloat16)
    wh9 = wh9.astype(jnp.bfloat16)
    b_col = bias.astype(jnp.float32).reshape(Ch4, 1)

    # Channel-major (C, H*W) layout; (B,T,C,H,W) -> (B*T,C,H*W) is a free reshape.
    x_cm = x_seq.astype(jnp.float32).reshape(B * T, Cin, HW)

    # ---- kernel 1: x-path gates, fully parallel over B*T ----
    xg = pl.pallas_call(
        functools.partial(_xgates_kernel, H=H, W=W),
        out_shape=jax.ShapeDtypeStruct((B * T, Ch4, HW), jnp.float32),
        grid_spec=pltpu.PrefetchScalarGridSpec(
            num_scalar_prefetch=0,
            grid=(B * T,),
            in_specs=[
                pl.BlockSpec((None, Cin, HW), lambda n: (n, 0, 0)),
                pl.BlockSpec((Ch4, 9 * Cin), lambda n: (0, 0)),
                pl.BlockSpec((Ch4, 1), lambda n: (0, 0)),
            ],
            out_specs=pl.BlockSpec((None, Ch4, HW), lambda n: (n, 0, 0)),
        ),
        compiler_params=pltpu.CompilerParams(
            dimension_semantics=("parallel",)),
    )(x_cm, wx9, b_col)
    xg = xg.reshape(B, T, Ch4, HW)

    # ---- kernel 2: serial recurrence over T, parallel over B ----
    out = pl.pallas_call(
        functools.partial(_convlstm_step_kernel, H=H, W=W),
        out_shape=jax.ShapeDtypeStruct((B, T, Ch, HW), jnp.float32),
        grid_spec=pltpu.PrefetchScalarGridSpec(
            num_scalar_prefetch=0,
            grid=(B, T),
            in_specs=[
                pl.BlockSpec((None, None, Ch4, HW),
                             lambda b, t: (b, t, 0, 0)),
                pl.BlockSpec((Ch4, 9 * Ch), lambda b, t: (0, 0)),
            ],
            out_specs=pl.BlockSpec((None, None, Ch, HW),
                                   lambda b, t: (b, t, 0, 0)),
            scratch_shapes=[
                pltpu.VMEM((Ch, HW), jnp.float32),   # h state
                pltpu.VMEM((Ch, HW), jnp.float32),   # c state
            ],
        ),
        compiler_params=pltpu.CompilerParams(
            dimension_semantics=("parallel", "arbitrary")),
    )(xg, wh9)

    # (B, T, Ch, H*W) -> (B, T, Ch, H, W): metadata-only reshape, already in
    # the PyTorch channel-major layout (no transpose needed).
    return out.reshape(B, T, Ch, H, W)


def convlstm_reference(x_seq, weight, bias):
    """Pure-JAX reference matching the PyTorch forward semantics."""
    B, T, Cin, H, W = x_seq.shape
    Ch = weight.shape[0] // 4
    h = jnp.zeros((B, Ch, H, W), jnp.float32)
    c = jnp.zeros_like(h)
    outs = []
    for t in range(T):
        comb = jnp.concatenate([x_seq[:, t], h], axis=1)
        gates = lax.conv_general_dilated(
            comb, weight, (1, 1), "SAME",
            dimension_numbers=("NCHW", "OIHW", "NCHW"),
            precision=lax.Precision.HIGHEST,
        ) + bias[None, :, None, None]
        i = jax.nn.sigmoid(gates[:, 0:Ch])
        f = jax.nn.sigmoid(gates[:, Ch:2 * Ch])
        o = jax.nn.sigmoid(gates[:, 2 * Ch:3 * Ch])
        g = jnp.tanh(gates[:, 3 * Ch:4 * Ch])
        c = f * c + i * g
        h = o * jnp.tanh(c)
        outs.append(h[:, None])
    return jnp.concatenate(outs, axis=1)


if __name__ == "__main__":
    # Shapes implied by the module: x_seq (B, T, Cin, H, W), hidden channels Ch.
    B, T, Cin, H, W, Ch = 2, 8, 4, 16, 16, 32

    key = jax.random.PRNGKey(0)
    kx, kw, kb = jax.random.split(key, 3)
    x_seq = jax.random.normal(kx, (B, T, Cin, H, W), jnp.float32)
    # Deterministic synthetic Conv2d parameters:
    #   weight (4*Ch, Cin+Ch, 3, 3), bias (4*Ch,)
    fan_in = (Cin + Ch) * 3 * 3
    bound = 1.0 / (fan_in ** 0.5)
    weight = jax.random.uniform(kw, (4 * Ch, Cin + Ch, 3, 3), jnp.float32,
                                -bound, bound)
    bias = jax.random.uniform(kb, (4 * Ch,), jnp.float32, -bound, bound)

    out = convlstm_pallas(x_seq, weight, bias)
    out = jax.block_until_ready(out)

    ref = convlstm_reference(x_seq, weight, bias)
    assert out.shape == (B, T, Ch, H, W), out.shape
    max_err = float(jnp.max(jnp.abs(out - ref)))
    assert jnp.allclose(out, ref, atol=1e-2, rtol=1e-2), (
        "max abs err = %e" % max_err)

    print("KERNEL_OK")
</pallas_src>

<mosaic_0001>
module attributes {stable_mosaic.version = 11 : i64} {
  func.func @_xgates_kernel(%arg0: i32, %arg1: memref<1x4x256xf32, #tpu.memory_space<vmem>>, %arg2: memref<128x36xbf16, #tpu.memory_space<vmem>>, %arg3: memref<128x1xf32, #tpu.memory_space<vmem>>, %arg4: memref<1x128x256xf32, #tpu.memory_space<vmem>>) attributes {dimension_semantics = [#tpu.dimension_semantics<parallel>], iteration_bounds = array<i64: 16>, scalar_prefetch = 0 : i64, scratch_operands = 0 : i64, tpu.core_type = #tpu.core_type<tc>, window_params = [{transform_indices = @transform_0, window_bounds = array<i64: 1, 4, 256>}, {pipeline_mode = #tpu.pipeline_mode<synchronous>, transform_indices = @transform_1, window_bounds = array<i64: 128, 36>}, {pipeline_mode = #tpu.pipeline_mode<synchronous>, transform_indices = @transform_2, window_bounds = array<i64: 128, 1>}, {transform_indices = @transform_3, window_bounds = array<i64: 1, 128, 256>}]} {
    %c0 = arith.constant 0 : index
    %c0_0 = arith.constant 0 : index
    %c0_1 = arith.constant 0 : index
    %0 = vector.load %arg1[%c0, %c0_0, %c0_1] : memref<1x4x256xf32, #tpu.memory_space<vmem>>, vector<1x4x256xf32>
    %1 = vector.shape_cast %0 : vector<1x4x256xf32> to vector<4x256xf32>
    %2 = tpu.iota {dimensions = array<i32: 1>} : vector<4x256xi32>
    %c16_i32 = arith.constant 16 : i32
    %c0_i32 = arith.constant 0 : i32
    %3 = arith.cmpi eq, %c16_i32, %c0_i32 : i32
    %c1_i32 = arith.constant 1 : i32
    %4 = arith.select %3, %c1_i32, %c16_i32 : i32
    %5 = vector.broadcast %4 : i32 to vector<4x256xi32>
    %6 = arith.remsi %2, %5 : vector<4x256xi32>
    %c0_i32_2 = arith.constant 0 : i32
    %7 = vector.broadcast %c0_i32_2 : i32 to vector<4x256xi32>
    %8 = arith.cmpi ne, %6, %7 : vector<4x256xi32>
    %c0_i32_3 = arith.constant 0 : i32
    %9 = vector.broadcast %c0_i32_3 : i32 to vector<4x256xi32>
    %10 = arith.cmpi slt, %6, %9 : vector<4x256xi32>
    %c0_i32_4 = arith.constant 0 : i32
    %11 = arith.cmpi slt, %4, %c0_i32_4 : i32
    %12 = vector.broadcast %11 : i1 to vector<4x256xi1>
    %13 = vector.broadcast %12 : vector<4x256xi1> to vector<4x256xi1>
    %14 = arith.xori %10, %13 : vector<4x256xi1>
    %15 = arith.andi %14, %8 : vector<4x256xi1>
    %16 = vector.broadcast %4 : i32 to vector<4x256xi32>
    %17 = arith.addi %6, %16 : vector<4x256xi32>
    %18 = arith.select %15, %17, %6 : vector<4x256xi1>, vector<4x256xi32>
    %cst = arith.constant 0.000000e+00 : f32
    %19 = vector.broadcast %cst : f32 to vector<4x17xf32>
    %20 = vector.extract_strided_slice %1 {offsets = [0, 0], sizes = [4, 239], strides = [1, 1]} : vector<4x256xf32> to vector<4x239xf32>
    %21 = tpu.concatenate %19, %20 in 1 : vector<4x17xf32>, vector<4x239xf32> -> vector<4x256xf32>
    %c0_i32_5 = arith.constant 0 : i32
    %22 = vector.broadcast %c0_i32_5 : i32 to vector<4x256xi32>
    %23 = arith.cmpi ne, %18, %22 : vector<4x256xi32>
    %cst_6 = arith.constant 0.000000e+00 : f32
    %24 = vector.broadcast %cst_6 : f32 to vector<4x256xf32>
    %25 = arith.select %23, %21, %24 : vector<4x256xi1>, vector<4x256xf32>
    %cst_7 = arith.constant 0.000000e+00 : f32
    %26 = vector.broadcast %cst_7 : f32 to vector<4x16xf32>
    %27 = vector.extract_strided_slice %1 {offsets = [0, 0], sizes = [4, 240], strides = [1, 1]} : vector<4x256xf32> to vector<4x240xf32>
    %28 = tpu.concatenate %26, %27 in 1 : vector<4x16xf32>, vector<4x240xf32> -> vector<4x256xf32>
    %cst_8 = arith.constant 0.000000e+00 : f32
    %29 = vector.broadcast %cst_8 : f32 to vector<4x15xf32>
    %30 = vector.extract_strided_slice %1 {offsets = [0, 0], sizes = [4, 241], strides = [1, 1]} : vector<4x256xf32> to vector<4x241xf32>
    %31 = tpu.concatenate %29, %30 in 1 : vector<4x15xf32>, vector<4x241xf32> -> vector<4x256xf32>
    %c15_i32 = arith.constant 15 : i32
    %32 = vector.broadcast %c15_i32 : i32 to vector<4x256xi32>
    %33 = arith.cmpi ne, %18, %32 : vector<4x256xi32>
    %cst_9 = arith.constant 0.000000e+00 : f32
    %34 = vector.broadcast %cst_9 : f32 to vector<4x256xf32>
    %35 = arith.select %33, %31, %34 : vector<4x256xi1>, vector<4x256xf32>
    %cst_10 = arith.constant 0.000000e+00 : f32
    %36 = vector.broadcast %cst_10 : f32 to vector<4x1xf32>
    %37 = vector.extract_strided_slice %1 {offsets = [0, 0], sizes = [4, 255], strides = [1, 1]} : vector<4x256xf32> to vector<4x255xf32>
    %38 = tpu.concatenate %36, %37 in 1 : vector<4x1xf32>, vector<4x255xf32> -> vector<4x256xf32>
    %c0_i32_11 = arith.constant 0 : i32
    %39 = vector.broadcast %c0_i32_11 : i32 to vector<4x256xi32>
    %40 = arith.cmpi ne, %18, %39 : vector<4x256xi32>
    %cst_12 = arith.constant 0.000000e+00 : f32
    %41 = vector.broadcast %cst_12 : f32 to vector<4x256xf32>
    %42 = arith.select %40, %38, %41 : vector<4x256xi1>, vector<4x256xf32>
    %43 = vector.extract_strided_slice %1 {offsets = [0, 1], sizes = [4, 255], strides = [1, 1]} : vector<4x256xf32> to vector<4x255xf32>
    %cst_13 = arith.constant 0.000000e+00 : f32
    %44 = vector.broadcast %cst_13 : f32 to vector<4x1xf32>
    %45 = tpu.concatenate %43, %44 in 1 : vector<4x255xf32>, vector<4x1xf32> -> vector<4x256xf32>
    %c15_i32_14 = arith.constant 15 : i32
    %46 = vector.broadcast %c15_i32_14 : i32 to vector<4x256xi32>
    %47 = arith.cmpi ne, %18, %46 : vector<4x256xi32>
    %cst_15 = arith.constant 0.000000e+00 : f32
    %48 = vector.broadcast %cst_15 : f32 to vector<4x256xf32>
    %49 = arith.select %47, %45, %48 : vector<4x256xi1>, vector<4x256xf32>
    %50 = vector.extract_strided_slice %1 {offsets = [0, 15], sizes = [4, 241], strides = [1, 1]} : vector<4x256xf32> to vector<4x241xf32>
    %cst_16 = arith.constant 0.000000e+00 : f32
    %51 = vector.broadcast %cst_16 : f32 to vector<4x15xf32>
    %52 = tpu.concatenate %50, %51 in 1 : vector<4x241xf32>, vector<4x15xf32> -> vector<4x256xf32>
    %c0_i32_17 = arith.constant 0 : i32
    %53 = vector.broadcast %c0_i32_17 : i32 to vector<4x256xi32>
    %54 = arith.cmpi ne, %18, %53 : vector<4x256xi32>
    %cst_18 = arith.constant 0.000000e+00 : f32
    %55 = vector.broadcast %cst_18 : f32 to vector<4x256xf32>
    %56 = arith.select %54, %52, %55 : vector<4x256xi1>, vector<4x256xf32>
    %57 = vector.extract_strided_slice %1 {offsets = [0, 16], sizes = [4, 240], strides = [1, 1]} : vector<4x256xf32> to vector<4x240xf32>
    %cst_19 = arith.constant 0.000000e+00 : f32
    %58 = vector.broadcast %cst_19 : f32 to vector<4x16xf32>
    %59 = tpu.concatenate %57, %58 in 1 : vector<4x240xf32>, vector<4x16xf32> -> vector<4x256xf32>
    %60 = vector.extract_strided_slice %1 {offsets = [0, 17], sizes = [4, 239], strides = [1, 1]} : vector<4x256xf32> to vector<4x239xf32>
    %cst_20 = arith.constant 0.000000e+00 : f32
    %61 = vector.broadcast %cst_20 : f32 to vector<4x17xf32>
    %62 = tpu.concatenate %60, %61 in 1 : vector<4x239xf32>, vector<4x17xf32> -> vector<4x256xf32>
    %c15_i32_21 = arith.constant 15 : i32
    %63 = vector.broadcast %c15_i32_21 : i32 to vector<4x256xi32>
    %64 = arith.cmpi ne, %18, %63 : vector<4x256xi32>
    %cst_22 = arith.constant 0.000000e+00 : f32
    %65 = vector.broadcast %cst_22 : f32 to vector<4x256xf32>
    %66 = arith.select %64, %62, %65 : vector<4x256xi1>, vector<4x256xf32>
    %67 = tpu.concatenate %25, %28, %35, %42, %1, %49, %56, %59, %66 in 0 : vector<4x256xf32>, vector<4x256xf32>, vector<4x256xf32>, vector<4x256xf32>, vector<4x256xf32>, vector<4x256xf32>, vector<4x256xf32>, vector<4x256xf32>, vector<4x256xf32> -> vector<36x256xf32>
    %68 = arith.truncf %67 : vector<36x256xf32> to vector<36x256xbf16>
    %c0_23 = arith.constant 0 : index
    %c0_24 = arith.constant 0 : index
    %69 = vector.load %arg2[%c0_23, %c0_24] : memref<128x36xbf16, #tpu.memory_space<vmem>>, vector<128x36xbf16>
    %cst_25 = arith.constant dense<0.000000e+00> : vector<128x256xf32>
    %70 = tpu.matmul %69, %68, %cst_25 {dimension_numbers = #tpu.dot_dimension_numbers<[1], [0], [0], [1], [0, 0, 1, 1], [], []>} : vector<128x36xbf16>, vector<36x256xbf16>, vector<128x256xf32> -> vector<128x256xf32>
    %c0_26 = arith.constant 0 : index
    %c0_27 = arith.constant 0 : index
    %71 = vector.load %arg3[%c0_26, %c0_27] : memref<128x1xf32, #tpu.memory_space<vmem>>, vector<128x1xf32>
    %72 = vector.broadcast %71 : vector<128x1xf32> to vector<128x256xf32>
    %73 = arith.addf %70, %72 : vector<128x256xf32>
    %c0_28 = arith.constant 0 : index
    %c0_29 = arith.constant 0 : index
    %c0_30 = arith.constant 0 : index
    %74 = vector.load %arg4[%c0_28, %c0_29, %c0_30] : memref<1x128x256xf32, #tpu.memory_space<vmem>>, vector<1x128x256xf32>
    %75 = vector.shape_cast %74 : vector<1x128x256xf32> to vector<128x256xf32>
    %76 = vector.shape_cast %73 : vector<128x256xf32> to vector<1x128x256xf32>
    tpu.vector_store %arg4[%c0_28, %c0_29, %c0_30], %76 {strides = array<i32>} : memref<1x128x256xf32, #tpu.memory_space<vmem>>, vector<1x128x256xf32>,
    return
  }
  func.func @transform_0(%arg0: i32) -> (i32, i32, i32) {
    %c0_i32 = arith.constant 0 : i32
    %c0_i32_0 = arith.constant 0 : i32
    %c0_i32_1 = arith.constant 0 : i32
    return %arg0, %c0_i32, %c0_i32_0 : i32, i32, i32
  }
  func.func @transform_1(%arg0: i32) -> (i32, i32) {
    %c0_i32 = arith.constant 0 : i32
    %c0_i32_0 = arith.constant 0 : i32
    %c0_i32_1 = arith.constant 0 : i32
    return %c0_i32, %c0_i32_0 : i32, i32
  }
  func.func @transform_2(%arg0: i32) -> (i32, i32) {
    %c0_i32 = arith.constant 0 : i32
    %c0_i32_0 = arith.constant 0 : i32
    %c0_i32_1 = arith.constant 0 : i32
    return %c0_i32, %c0_i32_0 : i32, i32
  }
  func.func @transform_3(%arg0: i32) -> (i32, i32, i32) {
    %c0_i32 = arith.constant 0 : i32
    %c0_i32_0 = arith.constant 0 : i32
    %c0_i32_1 = arith.constant 0 : i32
    return %arg0, %c0_i32, %c0_i32_0 : i32, i32, i32
  }
}

module attributes {stable_mosaic.version = 11 : i64} {
  func.func @_convlstm_step_kernel(%arg0: i32, %arg1: i32, %arg2: memref<1x1x128x256xf32, #tpu.memory_space<vmem>>, %arg3: memref<128x288xbf16, #tpu.memory_space<vmem>>, %arg4: memref<1x1x32x256xf32, #tpu.memory_space<vmem>>, %arg5: memref<32x256xf32, #tpu.memory_space<vmem>>, %arg6: memref<32x256xf32, #tpu.memory_space<vmem>>) attributes {dimension_semantics = [#tpu.dimension_semantics<parallel>, #tpu.dimension_semantics<arbitrary>], iteration_bounds = array<i64: 2, 8>, scalar_prefetch = 0 : i64, scratch_operands = 2 : i64, tpu.core_type = #tpu.core_type<tc>, window_params = [{transform_indices = @transform_0, window_bounds = array<i64: 1, 1, 128, 256>}, {pipeline_mode = #tpu.pipeline_mode<synchronous>, transform_indices = @transform_1, window_bounds = array<i64: 128, 288>}, {transform_indices = @transform_2, window_bounds = array<i64: 1, 1, 32, 256>}]} {
    %c0_i32 = arith.constant 0 : i32
    %0 = arith.cmpi eq, %arg1, %c0_i32 : i32
    %1 = arith.extui %0 : i1 to i32
    %c0_i32_0 = arith.constant 0 : i32
    %2 = arith.cmpi ne, %1, %c0_i32_0 : i32
    scf.if %2 {
      %cst_44 = arith.constant 0.000000e+00 : f32
      %107 = vector.broadcast %cst_44 : f32 to vector<32x256xf32>
      %c0_45 = arith.constant 0 : index
      %c0_46 = arith.constant 0 : index
      %108 = vector.load %arg5[%c0_45, %c0_46] : memref<32x256xf32, #tpu.memory_space<vmem>>, vector<32x256xf32>
      tpu.vector_store %arg5[%c0_45, %c0_46], %107 {strides = array<i32>} : memref<32x256xf32, #tpu.memory_space<vmem>>, vector<32x256xf32>,
      %cst_47 = arith.constant 0.000000e+00 : f32
      %109 = vector.broadcast %cst_47 : f32 to vector<32x256xf32>
      %c0_48 = arith.constant 0 : index
      %c0_49 = arith.constant 0 : index
      %110 = vector.load %arg6[%c0_48, %c0_49] : memref<32x256xf32, #tpu.memory_space<vmem>>, vector<32x256xf32>
      tpu.vector_store %arg6[%c0_48, %c0_49], %109 {strides = array<i32>} : memref<32x256xf32, #tpu.memory_space<vmem>>, vector<32x256xf32>,
    } else {
    }
    %c0 = arith.constant 0 : index
    %c0_1 = arith.constant 0 : index
    %3 = vector.load %arg5[%c0, %c0_1] : memref<32x256xf32, #tpu.memory_space<vmem>>, vector<32x256xf32>
    %4 = tpu.iota {dimensions = array<i32: 1>} : vector<32x256xi32>
    %c16_i32 = arith.constant 16 : i32
    %c0_i32_2 = arith.constant 0 : i32
    %5 = arith.cmpi eq, %c16_i32, %c0_i32_2 : i32
    %c1_i32 = arith.constant 1 : i32
    %6 = arith.select %5, %c1_i32, %c16_i32 : i32
    %7 = vector.broadcast %6 : i32 to vector<32x256xi32>
    %8 = arith.remsi %4, %7 : vector<32x256xi32>
    %c0_i32_3 = arith.constant 0 : i32
    %9 = vector.broadcast %c0_i32_3 : i32 to vector<32x256xi32>
    %10 = arith.cmpi ne, %8, %9 : vector<32x256xi32>
    %c0_i32_4 = arith.constant 0 : i32
    %11 = vector.broadcast %c0_i32_4 : i32 to vector<32x256xi32>
    %12 = arith.cmpi slt, %8, %11 : vector<32x256xi32>
    %c0_i32_5 = arith.constant 0 : i32
    %13 = arith.cmpi slt, %6, %c0_i32_5 : i32
    %14 = vector.broadcast %13 : i1 to vector<32x256xi1>
    %15 = vector.broadcast %14 : vector<32x256xi1> to vector<32x256xi1>
    %16 = arith.xori %12, %15 : vector<32x256xi1>
    %17 = arith.andi %16, %10 : vector<32x256xi1>
    %18 = vector.broadcast %6 : i32 to vector<32x256xi32>
    %19 = arith.addi %8, %18 : vector<32x256xi32>
    %20 = arith.select %17, %19, %8 : vector<32x256xi1>, vector<32x256xi32>
    %cst = arith.constant 0.000000e+00 : f32
    %21 = vector.broadcast %cst : f32 to vector<32x17xf32>
    %22 = vector.extract_strided_slice %3 {offsets = [0, 0], sizes = [32, 239], strides = [1, 1]} : vector<32x256xf32> to vector<32x239xf32>
    %23 = tpu.concatenate %21, %22 in 1 : vector<32x17xf32>, vector<32x239xf32> -> vector<32x256xf32>
    %c0_i32_6 = arith.constant 0 : i32
    %24 = vector.broadcast %c0_i32_6 : i32 to vector<32x256xi32>
    %25 = arith.cmpi ne, %20, %24 : vector<32x256xi32>
    %cst_7 = arith.constant 0.000000e+00 : f32
    %26 = vector.broadcast %cst_7 : f32 to vector<32x256xf32>
    %27 = arith.select %25, %23, %26 : vector<32x256xi1>, vector<32x256xf32>
    %cst_8 = arith.constant 0.000000e+00 : f32
    %28 = vector.broadcast %cst_8 : f32 to vector<32x16xf32>
    %29 = vector.extract_strided_slice %3 {offsets = [0, 0], sizes = [32, 240], strides = [1, 1]} : vector<32x256xf32> to vector<32x240xf32>
    %30 = tpu.concatenate %28, %29 in 1 : vector<32x16xf32>, vector<32x240xf32> -> vector<32x256xf32>
    %cst_9 = arith.constant 0.000000e+00 : f32
    %31 = vector.broadcast %cst_9 : f32 to vector<32x15xf32>
    %32 = vector.extract_strided_slice %3 {offsets = [0, 0], sizes = [32, 241], strides = [1, 1]} : vector<32x256xf32> to vector<32x241xf32>
    %33 = tpu.concatenate %31, %32 in 1 : vector<32x15xf32>, vector<32x241xf32> -> vector<32x256xf32>
    %c15_i32 = arith.constant 15 : i32
    %34 = vector.broadcast %c15_i32 : i32 to vector<32x256xi32>
    %35 = arith.cmpi ne, %20, %34 : vector<32x256xi32>
    %cst_10 = arith.constant 0.000000e+00 : f32
    %36 = vector.broadcast %cst_10 : f32 to vector<32x256xf32>
    %37 = arith.select %35, %33, %36 : vector<32x256xi1>, vector<32x256xf32>
    %cst_11 = arith.constant 0.000000e+00 : f32
    %38 = vector.broadcast %cst_11 : f32 to vector<32x1xf32>
    %39 = vector.extract_strided_slice %3 {offsets = [0, 0], sizes = [32, 255], strides = [1, 1]} : vector<32x256xf32> to vector<32x255xf32>
    %40 = tpu.concatenate %38, %39 in 1 : vector<32x1xf32>, vector<32x255xf32> -> vector<32x256xf32>
    %c0_i32_12 = arith.constant 0 : i32
    %41 = vector.broadcast %c0_i32_12 : i32 to vector<32x256xi32>
    %42 = arith.cmpi ne, %20, %41 : vector<32x256xi32>
    %cst_13 = arith.constant 0.000000e+00 : f32
    %43 = vector.broadcast %cst_13 : f32 to vector<32x256xf32>
    %44 = arith.select %42, %40, %43 : vector<32x256xi1>, vector<32x256xf32>
    %45 = vector.extract_strided_slice %3 {offsets = [0, 1], sizes = [32, 255], strides = [1, 1]} : vector<32x256xf32> to vector<32x255xf32>
    %cst_14 = arith.constant 0.000000e+00 : f32
    %46 = vector.broadcast %cst_14 : f32 to vector<32x1xf32>
    %47 = tpu.concatenate %45, %46 in 1 : vector<32x255xf32>, vector<32x1xf32> -> vector<32x256xf32>
    %c15_i32_15 = arith.constant 15 : i32
    %48 = vector.broadcast %c15_i32_15 : i32 to vector<32x256xi32>
    %49 = arith.cmpi ne, %20, %48 : vector<32x256xi32>
    %cst_16 = arith.constant 0.000000e+00 : f32
    %50 = vector.broadcast %cst_16 : f32 to vector<32x256xf32>
    %51 = arith.select %49, %47, %50 : vector<32x256xi1>, vector<32x256xf32>
    %52 = vector.extract_strided_slice %3 {offsets = [0, 15], sizes = [32, 241], strides = [1, 1]} : vector<32x256xf32> to vector<32x241xf32>
    %cst_17 = arith.constant 0.000000e+00 : f32
    %53 = vector.broadcast %cst_17 : f32 to vector<32x15xf32>
    %54 = tpu.concatenate %52, %53 in 1 : vector<32x241xf32>, vector<32x15xf32> -> vector<32x256xf32>
    %c0_i32_18 = arith.constant 0 : i32
    %55 = vector.broadcast %c0_i32_18 : i32 to vector<32x256xi32>
    %56 = arith.cmpi ne, %20, %55 : vector<32x256xi32>
    %cst_19 = arith.constant 0.000000e+00 : f32
    %57 = vector.broadcast %cst_19 : f32 to vector<32x256xf32>
    %58 = arith.select %56, %54, %57 : vector<32x256xi1>, vector<32x256xf32>
    %59 = vector.extract_strided_slice %3 {offsets = [0, 16], sizes = [32, 240], strides = [1, 1]} : vector<32x256xf32> to vector<32x240xf32>
    %cst_20 = arith.constant 0.000000e+00 : f32
    %60 = vector.broadcast %cst_20 : f32 to vector<32x16xf32>
    %61 = tpu.concatenate %59, %60 in 1 : vector<32x240xf32>, vector<32x16xf32> -> vector<32x256xf32>
    %62 = vector.extract_strided_slice %3 {offsets = [0, 17], sizes = [32, 239], strides = [1, 1]} : vector<32x256xf32> to vector<32x239xf32>
    %cst_21 = arith.constant 0.000000e+00 : f32
    %63 = vector.broadcast %cst_21 : f32 to vector<32x17xf32>
    %64 = tpu.concatenate %62, %63 in 1 : vector<32x239xf32>, vector<32x17xf32> -> vector<32x256xf32>
    %c15_i32_22 = arith.constant 15 : i32
    %65 = vector.broadcast %c15_i32_22 : i32 to vector<32x256xi32>
    %66 = arith.cmpi ne, %20, %65 : vector<32x256xi32>
    %cst_23 = arith.constant 0.000000e+00 : f32
    %67 = vector.broadcast %cst_23 : f32 to vector<32x256xf32>
    %68 = arith.select %66, %64, %67 : vector<32x256xi1>, vector<32x256xf32>
    %69 = tpu.concatenate %27, %30, %37, %44, %3, %51, %58, %61, %68 in 0 : vector<32x256xf32>, vector<32x256xf32>, vector<32x256xf32>, vector<32x256xf32>, vector<32x256xf32>, vector<32x256xf32>, vector<32x256xf32>, vector<32x256xf32>, vector<32x256xf32> -> vector<288x256xf32>
    %70 = arith.truncf %69 : vector<288x256xf32> to vector<288x256xbf16>
    %c0_24 = arith.constant 0 : index
    %c0_25 = arith.constant 0 : index
    %c0_26 = arith.constant 0 : index
    %c0_27 = arith.constant 0 : index
    %71 = vector.load %arg2[%c0_24, %c0_25, %c0_26, %c0_27] : memref<1x1x128x256xf32, #tpu.memory_space<vmem>>, vector<1x1x128x256xf32>
    %72 = vector.shape_cast %71 : vector<1x1x128x256xf32> to vector<128x256xf32>
    %c0_28 = arith.constant 0 : index
    %c0_29 = arith.constant 0 : index
    %73 = vector.load %arg3[%c0_28, %c0_29] : memref<128x288xbf16, #tpu.memory_space<vmem>>, vector<128x288xbf16>
    %cst_30 = arith.constant dense<0.000000e+00> : vector<128x256xf32>
    %74 = tpu.matmul %73, %70, %cst_30 {dimension_numbers = #tpu.dot_dimension_numbers<[1], [0], [0], [1], [0, 0, 1, 1], [], []>} : vector<128x288xbf16>, vector<288x256xbf16>, vector<128x256xf32> -> vector<128x256xf32>
    %75 = arith.addf %72, %74 : vector<128x256xf32>
    %76 = vector.extract_strided_slice %75 {offsets = [0, 0], sizes = [32, 256], strides = [1, 1]} : vector<128x256xf32> to vector<32x256xf32>
    %77 = arith.negf %76 : vector<32x256xf32>
    %78 = math.exp %77 : vector<32x256xf32>
    %cst_31 = arith.constant 1.000000e+00 : f32
    %79 = vector.broadcast %cst_31 : f32 to vector<32x256xf32>
    %80 = arith.addf %79, %78 : vector<32x256xf32>
    %81 = arith.divf %79, %80 : vector<32x256xf32>
    %82 = vector.extract_strided_slice %75 {offsets = [32, 0], sizes = [32, 256], strides = [1, 1]} : vector<128x256xf32> to vector<32x256xf32>
    %83 = arith.negf %82 : vector<32x256xf32>
    %84 = math.exp %83 : vector<32x256xf32>
    %cst_32 = arith.constant 1.000000e+00 : f32
    %85 = vector.broadcast %cst_32 : f32 to vector<32x256xf32>
    %86 = arith.addf %85, %84 : vector<32x256xf32>
    %87 = arith.divf %85, %86 : vector<32x256xf32>
    %88 = vector.extract_strided_slice %75 {offsets = [64, 0], sizes = [32, 256], strides = [1, 1]} : vector<128x256xf32> to vector<32x256xf32>
    %89 = arith.negf %88 : vector<32x256xf32>
    %90 = math.exp %89 : vector<32x256xf32>
    %cst_33 = arith.constant 1.000000e+00 : f32
    %91 = vector.broadcast %cst_33 : f32 to vector<32x256xf32>
    %92 = arith.addf %91, %90 : vector<32x256xf32>
    %93 = arith.divf %91, %92 : vector<32x256xf32>
    %94 = vector.extract_strided_slice %75 {offsets = [96, 0], sizes = [32, 256], strides = [1, 1]} : vector<128x256xf32> to vector<32x256xf32>
    %95 = math.tanh %94 : vector<32x256xf32>
    %c0_34 = arith.constant 0 : index
    %c0_35 = arith.constant 0 : index
    %96 = vector.load %arg6[%c0_34, %c0_35] : memref<32x256xf32, #tpu.memory_space<vmem>>, vector<32x256xf32>
    %97 = arith.mulf %87, %96 : vector<32x256xf32>
    %98 = arith.mulf %81, %95 : vector<32x256xf32>
    %99 = arith.addf %97, %98 : vector<32x256xf32>
    %100 = math.tanh %99 : vector<32x256xf32>
    %101 = arith.mulf %93, %100 : vector<32x256xf32>
    %c0_36 = arith.constant 0 : index
    %c0_37 = arith.constant 0 : index
    %102 = vector.load %arg6[%c0_36, %c0_37] : memref<32x256xf32, #tpu.memory_space<vmem>>, vector<32x256xf32>
    tpu.vector_store %arg6[%c0_36, %c0_37], %99 {strides = array<i32>} : memref<32x256xf32, #tpu.memory_space<vmem>>, vector<32x256xf32>,
    %c0_38 = arith.constant 0 : index
    %c0_39 = arith.constant 0 : index
    %103 = vector.load %arg5[%c0_38, %c0_39] : memref<32x256xf32, #tpu.memory_space<vmem>>, vector<32x256xf32>
    tpu.vector_store %arg5[%c0_38, %c0_39], %101 {strides = array<i32>} : memref<32x256xf32, #tpu.memory_space<vmem>>, vector<32x256xf32>,
    %c0_40 = arith.constant 0 : index
    %c0_41 = arith.constant 0 : index
    %c0_42 = arith.constant 0 : index
    %c0_43 = arith.constant 0 : index
    %104 = vector.load %arg4[%c0_40, %c0_41, %c0_42, %c0_43] : memref<1x1x32x256xf32, #tpu.memory_space<vmem>>, vector<1x1x32x256xf32>
    %105 = vector.shape_cast %104 : vector<1x1x32x256xf32> to vector<32x256xf32>
    %106 = vector.shape_cast %101 : vector<32x256xf32> to vector<1x1x32x256xf32>
    tpu.vector_store %arg4[%c0_40, %c0_41, %c0_42, %c0_43], %106 {strides = array<i32>} : memref<1x1x32x256xf32, #tpu.memory_space<vmem>>, vector<1x1x32x256xf32>,
    return
  }
  func.func @transform_0(%arg0: i32, %arg1: i32) -> (i32, i32, i32, i32) {
    %c0_i32 = arith.constant 0 : i32
    %c0_i32_0 = arith.constant 0 : i32
    %c0_i32_1 = arith.constant 0 : i32
    return %arg0, %arg1, %c0_i32, %c0_i32_0 : i32, i32, i32, i32
  }
  func.func @transform_1(%arg0: i32, %arg1: i32) -> (i32, i32) {
    %c0_i32 = arith.constant 0 : i32
    %c0_i32_0 = arith.constant 0 : i32
    %c0_i32_1 = arith.constant 0 : i32
    return %c0_i32, %c0_i32_0 : i32, i32
  }
  func.func @transform_2(%arg0: i32, %arg1: i32) -> (i32, i32, i32, i32) {
    %c0_i32 = arith.constant 0 : i32
    %c0_i32_0 = arith.constant 0 : i32
    %c0_i32_1 = arith.constant 0 : i32
    return %arg0, %arg1, %c0_i32, %c0_i32_0 : i32, i32, i32, i32
  }
}

</mosaic_0001>

<bundles_post_ra>
// kernel: convlstm_pallas.2
= control target key start
LH: loop header
LB: loop body
LE: loop exit
PB: predicated region body
PF: predicated region fallthrough
CT: control target
= control target key end

     0   :  { %s851_s12 = smov 0   ;;  %s1091_s0 = inlined_call_operand.vmem [shape: f32[16,4,256], index: 0, kind: input, shape index: {}]   ;;  %s1092_s1 = inlined_call_operand.vmem [shape: bf16[128,36], index: 1, kind: input, shape index: {}]   ;;  %s1093_s2 = inlined_call_operand.vmem [shape: f32[128,1], index: 2, kind: input, shape index: {}]   ;;  %s1094_s3 = inlined_call_operand.vmem [shape: f32[16,128,256], index: 3, kind: output, shape index: {}]  }
   0x1 LB: > { %s710_s13 = sadd.s32 4294967295, %s820_s12   ;;  %p714_p0 = scmp.ge.s32.totalorder %s820_s12, 1  ;;  %s820_s12 = sphi %s851_s12, %s13_s12  }
   0x2   : > { %p137_p1 = scmp.lt.s32.totalorder %s820_s12, 17 }
   0x4   : > { %p138_p2 = pnand %p714_p0, %p137_p1 }
   0x5   : > { %p161_p3 = scmp.lt.s32.totalorder (!%p138_p2), %s710_s13, 15  ;;  %s822_s18 = smov (!%p138_p2), 112  }
   0x6   : > { %141 = sbr.rel (%p138_p2) target bundleno = 384 (0x180), region = 32  ;;  %s823_s19 = smov (!%p138_p2), 111  }
   0x7   : > { %s824_s20 = smov (!%p138_p2), 113   ;;  %s825_s21 = smov (!%p138_p2), 127  }
   0x8   : > { %s826_s22 = smov (!%p138_p2), 16   ;;  %s827_s23 = smov (!%p138_p2), 1  }
   0x9   : > { %s829_s24 = smov (!%p138_p2), 15   ;;  %s830_s25 = smov (!%p138_p2), 17  }
   0xb   : > { %s1104_s13 = smov (!%p161_p3, %s710_s13), 15  ;;  %v828_v4 = vmov 0   ;;  %v343_v5 = vld [vmem:[%s1093_s2 + $0x8] sm:$0xff]  ;;  %v342_v6 = vld [vmem:[%s1093_s2] sm:$0xff]  ;;  %v344_v7 = vld [vmem:[%s1093_s2 + $0x10] sm:$0xff]  ;;  %v173_v21 = vlaneseq  ;;  %vm273_vm0 = vcmask 916480  }
   0xc   : > { %s738_s14 = sshll.u32 %s1104_s13, 3  ;;  %542 = vmatprep.mubr.bf16.mxu0 %v828_v4  ;;  %582 = vmatprep.mubr.bf16.mxu1 %v828_v4  ;;  %v345_v8 = vld [vmem:[%s1093_s2 + $0x18] sm:$0xff]  ;;  %v346_v9 = vld [vmem:[%s1093_s2 + $0x20] sm:$0xff]  ;;  %v347_v10 = vld [vmem:[%s1093_s2 + $0x28] sm:$0xff]  ;;  %vm262_vm1 = vcmask 924672   ;;  %vm281_vm2 = vcmask 908288  }
   0xd   : > { %s165_s17 = scalar_lea.vmem %s1091_s0, %s738_s14  ;;  %804 = vset.pattern.permute.xlu1 %v828_v4  ;;  %803 = vset.pattern.permute.xlu0 %v828_v4  ;;  %v348_v11 = vld [vmem:[%s1093_s2 + $0x30] sm:$0xff]  ;;  %v349_v12 = vld [vmem:[%s1093_s2 + $0x38] sm:$0xff]  ;;  %v350_v13 = vld [vmem:[%s1093_s2 + $0x40] sm:$0xff]  ;;  %v174_v22 = vand.u32 127, %v173_v21  ;;  %vm251_vm3 = vcmask 1039360   ;;  %vm503_vm5 = vcmask 1041408  }
   0xe   : > { %v865_v0 = vld [vmem:[%s165_s17] sm:$0xff]  ;;  %v351_v14 = vld [vmem:[%s1093_s2 + $0x48] sm:$0xff]  ;;  %v352_v15 = vld [vmem:[%s1093_s2 + $0x50] sm:$0xff]  ;;  %vm219_vm8 = vcmask 130048   ;;  %vm311_vm10 = vcmask 1043456   ;;  %vm240_vm11 = vcmask 7168  }
   0xf   : > { %v869_v1 = vcombine.high %v865_v0, %v865_v0  ;;  %v353_v16 = vld [vmem:[%s1093_s2 + $0x58] sm:$0xff]  ;;  %v354_v17 = vld [vmem:[%s1093_s2 + $0x60] sm:$0xff]  ;;  %v355_v18 = vld [vmem:[%s1093_s2 + $0x68] sm:$0xff]  ;;  %v175_v23 = vadd.s32 128, %v174_v22  ;;  %v180_v25 = vand.u32 15, %v174_v22  ;;  %vm227_vm12 = vcmask 121856  }
  0x10   : > { %v356_v19 = vld [vmem:[%s1093_s2 + $0x70] sm:$0xff]  ;;  %v357_v20 = vld [vmem:[%s1093_s2 + $0x78] sm:$0xff]  ;;  %vm206_vm13 = vcmask 138240   ;;  %v806_v34 = vld [vmem:[%s1092_s1] sm:$0xff]   ;;  %vm478_vm14 = vcmask 293888  }
  0x11   : > { %v773_v2 = vpack.i.bf16 %v865_v0, %v869_v1  ;;  %v763_v3 = vpack.i.bf16 %v869_v1, %v865_v0  ;;  %v187_v24 = vand.u32 15, %v175_v23  ;;  %vm931_vm6 = vcmp.ne.s32.totalorder %v180_v25, 15  ;;  %v807_v28 = vld [vmem:[%s1092_s1 + $0x20] sm:$0xff]  }
  0x12   : > { %vm939_vm9 = vcmp.ne.s32.totalorder %v180_v25, 0 }
  0x13   : > { %774 = vrot.lane.b32.xlu1 %v773_v2, %s822_s18  ;;  %764 = vrot.lane.b32.xlu0 %v763_v3, %s823_s19  ;;  %vm927_vm4 = vcmp.ne.s32.totalorder %v187_v24, 15  ;;  %vm935_vm7 = vcmp.ne.s32.totalorder %v187_v24, 0 }
  0x17   : > { %779 = vrot.lane.b32.xlu1 %v773_v2, %s824_s20  ;;  %769 = vrot.lane.b32.xlu0 %v773_v2, %s825_s21 }
  0x1b   : > { %789 = vrot.lane.b32.xlu1 %v763_v3, %s826_s22  ;;  %784 = vrot.lane.b32.xlu0 %v763_v3, %s827_s23 }
  0x1f   : > { %799 = vrot.lane.b32.xlu1 %v763_v3, %s829_s24  ;;  %794 = vrot.lane.b32.xlu0 %v763_v3, %s830_s25  ;;  %s739_s24 = sshll.u32 %s1104_s13, 8 }
  0x20   : > { %s1046_s27 = scalar_lea.vmem %s1094_s3, %s739_s24 }
  0x23   : > { %365 = vperm.xlu1 %804, %v343_v5   ;;  %360 = vperm.xlu0 %803, %v342_v6  }
  0x27   : > { %370 = vperm.xlu1 %804, %v344_v7   ;;  %375 = vperm.xlu0 %803, %v345_v8  }
  0x2b   : > { %380 = vperm.xlu1 %804, %v346_v9   ;;  %385 = vperm.xlu0 %803, %v347_v10  }
  0x2f   : > { %390 = vperm.xlu1 %804, %v348_v11   ;;  %395 = vperm.xlu0 %803, %v349_v12  }
  0x33   : > { %400 = vperm.xlu1 %804, %v350_v13   ;;  %405 = vperm.xlu0 %803, %v351_v14  }
  0x37   : > { %410 = vperm.xlu1 %804, %v352_v15   ;;  %415 = vperm.xlu0 %803, %v353_v16  }
  0x3b   : > { %420 = vperm.xlu1 %804, %v354_v17   ;;  %425 = vperm.xlu0 %803, %v355_v18  }
  0x3f   : > { %430 = vperm.xlu1 %804, %v356_v19   ;;  %435 = vperm.xlu0 %803, %v357_v20  }
  0x85   : > { %v775_v26 = vpop.permute.xlu1 %774  ;;  %v765_v27 = vpop.permute.xlu0 %764 }
  0x86   : > { %v777_v30 = vunpack.i.h.bf16 %v775_v26  ;;  %v776_v31 = vunpack.i.l.bf16 %v775_v26  ;;  %v767_v32 = vunpack.i.h.bf16 %v765_v27  ;;  %v766_v33 = vunpack.i.l.bf16 %v765_v27 }
  0x88   : > { %v274_v36 = vsel %vm273_vm0, %v777_v30, %v776_v31  ;;  %v276_v37 = vsel %vm273_vm0, %v776_v31, 0.0  ;;  %v285_v38 = vsel %vm281_vm2, %v767_v32, 0.0  ;;  %v282_v39 = vsel %vm281_vm2, %v766_v33, %v767_v32 }
  0x89   : > { %v780_v40 = vpop.permute.xlu1 %779  ;;  %v770_v41 = vpop.permute.xlu0 %769  ;;  %v287_v42 = vsel %vm927_vm4, %v285_v38, 0.0  ;;  %v286_v43 = vsel %vm931_vm6, %v282_v39, 0.0  ;;  %v307_v48 = vrot.slane %v274_v36, 4  ;;  %v308_v49 = vrot.slane %v276_v37, 4 }
  0x8a   : > { %v782_v44 = vunpack.i.h.bf16 %v780_v40  ;;  %v781_v45 = vunpack.i.l.bf16 %v780_v40  ;;  %v772_v46 = vunpack.i.h.bf16 %v770_v41  ;;  %v771_v47 = vunpack.i.l.bf16 %v770_v41 }
  0x8b   : > { %v325_v50 = vpack.c.bf16 %v287_v42, %v287_v42  ;;  %v324_v51 = vpack.c.bf16 %v286_v43, %v286_v43 }
  0x8c   : > { %v263_v52 = vsel %vm262_vm1, %v782_v44, %v781_v45  ;;  %v266_v53 = vsel %vm262_vm1, %v781_v45, 0.0  ;;  %v252_v54 = vsel %vm251_vm3, %v772_v46, %v771_v47  ;;  %v255_v55 = vsel %vm251_vm3, %v771_v47, 0.0  ;;  %v808_v44 = vld [vmem:[%s1092_s1 + $0x8] sm:$0xff]   ;;  %v810_v46 = vld [vmem:[%s1092_s1 + $0x10] sm:$0xff]  }
  0x8d   : > { %v268_v56 = vsel %vm935_vm7, %v266_v53, 0.0  ;;  %v257_v57 = vsel %vm927_vm4, %v255_v55, 0.0  ;;  %727 = vmatprep.subr.msk.bf16.mxu0 %vm503_vm5, %v325_v50  ;;  %740 = vmatprep.subr.msk.bf16.mxu1 %vm503_vm5, %v325_v50  ;;  %v790_v58 = vpop.permute.xlu1 %789  ;;  %v785_v59 = vpop.permute.xlu0 %784  ;;  %v256_v60 = vsel %vm931_vm6, %v252_v54, 0.0  ;;  %v505_v61 = vsel %vm503_vm5, %v324_v51, 0  ;;  %v809_v45 = vld [vmem:[%s1092_s1 + $0x28] sm:$0xff]   ;;  %v811_v47 = vld [vmem:[%s1092_s1 + $0x30] sm:$0xff]  }
  0x8e   : > { %v303_v62 = vrot.slane %v257_v57, 4  ;;  %v792_v63 = vunpack.i.h.bf16 %v790_v58  ;;  %v791_v2 = vunpack.i.l.bf16 %v790_v58  ;;  %v787_v3 = vunpack.i.h.bf16 %v785_v59  ;;  %521 = vmatpush1.bf16.msra.mxu0 %v505_v61  ;;  %743 = vmatpush1.bf16.msra.mxu1 %v505_v61 }
  0x8f   : > { %v786_v5 = vunpack.i.l.bf16 %v785_v59  ;;  %v302_v6 = vrot.slane %v256_v60, 4  ;;  %v319_v7 = vsel %vm311_vm10, %v268_v56, %v308_v49  ;;  %v267_v8 = vsel %vm939_vm9, %v263_v52, 0.0  ;;  %v813_v49 = vld [vmem:[%s1092_s1 + $0x38] sm:$0xff]  }
  0x90   : > { %v220_v9 = vsel %vm219_vm8, %v791_v2, %v792_v63  ;;  %v222_v10 = vsel %vm219_vm8, 0.0, %v791_v2  ;;  %v317_v11 = vsel %vm311_vm10, %v869_v1, %v303_v62  ;;  %v318_v12 = vsel %vm311_vm10, %v267_v8, %v307_v48  ;;  %v812_v48 = vld [vmem:[%s1092_s1 + $0x18] sm:$0xff]  }
  0x91   : > { %v289_v13 = vrot.slane %v222_v10, 4  ;;  %v290_v14 = vrot.slane %v220_v9, 4  ;;  %v241_v15 = vsel %vm240_vm11, %v786_v5, %v787_v3  ;;  %v244_v16 = vsel %vm240_vm11, 0.0, %v786_v5  ;;  %v800_v17 = vpop.permute.xlu1 %799  ;;  %v795_v18 = vpop.permute.xlu0 %794 }
  0x92   : > { %v245_v19 = vsel %vm939_vm9, %v244_v16, 0.0  ;;  %v246_v20 = vsel %vm935_vm7, %v241_v15, 0.0  ;;  %v802_v21 = vunpack.i.h.bf16 %v800_v17  ;;  %v801_v22 = vunpack.i.l.bf16 %v800_v17 }
  0x93   : > { %v295_v23 = vrot.slane %v245_v19, 4  ;;  %v296_v1 = vrot.slane %v246_v20, 4  ;;  %v797_v24 = vunpack.i.h.bf16 %v795_v18  ;;  %v796_v25 = vunpack.i.l.bf16 %v795_v18 }
  0x94   : > { %v228_v26 = vsel %vm227_vm12, %v801_v22, %v802_v21  ;;  %v231_v27 = vsel %vm227_vm12, 0.0, %v801_v22  ;;  %v323_v30 = vpack.c.bf16 %v319_v7, %v317_v11  ;;  %v316_v31 = vsel %vm311_vm10, %v865_v0, %v302_v6 }
  0x95   : > { %v234_v32 = vsel %vm931_vm6, %v231_v27, 0.0  ;;  %v207_v33 = vsel %vm206_vm13, %v796_v25, %v797_v24  ;;  %v210_v36 = vsel %vm206_vm13, 0.0, %v796_v25  ;;  %v322_v37 = vpack.c.bf16 %v318_v12, %v316_v31 }
  0x96   : > { %v213_v38 = vsel %vm939_vm9, %v210_v36, 0.0  ;;  %522 = vmatprep.subr.bf16.mxu0 %v323_v30  ;;  %741 = vmatprep.subr.bf16.mxu1 %v323_v30  ;;  %v214_v39 = vsel %vm935_vm7, %v207_v33, 0.0  ;;  %v235_v40 = vsel %vm927_vm4, %v228_v26, 0.0  ;;  %v314_v0 = vsel %vm311_vm10, %v234_v32, %v295_v23 }
  0x97   : > { %523 = vmatpush1.bf16.msra.mxu0 %v322_v37  ;;  %744 = vmatpush1.bf16.msra.mxu1 %v322_v37  ;;  %v313_v29 = vsel %vm311_vm10, %v214_v39, %v290_v14  ;;  %v315_v41 = vsel %vm311_vm10, %v235_v40, %v296_v1  ;;  %v312_v42 = vsel %vm311_vm10, %v213_v38, %v289_v13 }
  0x98   : > { %v321_v35 = vpack.c.bf16 %v315_v41, %v313_v29  ;;  %v320_v43 = vpack.c.bf16 %v314_v0, %v312_v42 }
  0x9a   : > { %524 = vmatprep.subr.bf16.mxu0 %v321_v35  ;;  %742 = vmatprep.subr.bf16.mxu1 %v321_v35 }
  0x9b   : > { %525 = vmatpush1.bf16.msra.mxu0 %v320_v43  ;;  %745 = vmatpush1.bf16.msra.mxu1 %v320_v43 }
  0x9e   : > { %728 = vmatmul.mubr.msk.bf16.vlgmr.msra.gmra.mxu0 %vm478_vm14, %v806_v34  ;;  %732 = vmatmul.mubr.msk.bf16.vlgmr.msra.gmra.mxu1 %vm478_vm14, %v807_v28  ;;  %v366_v50 = vpop.permute.xlu1 %365  ;;  %v361_v51 = vpop.permute.xlu0 %360 }
  0x9f   : > { %552 = vmatprep.mubr.bf16.mxu0 %v828_v4  ;;  %592 = vmatprep.mubr.bf16.mxu1 %v828_v4 }
  0xa2   : > { %v371_v52 = vpop.permute.xlu1 %370  ;;  %v376_v53 = vpop.permute.xlu0 %375 }
  0xa6   : > { %729 = vmatmul.mubr.msk.bf16.gmra.mxu0 %vm478_vm14, %v808_v44  ;;  %733 = vmatmul.mubr.msk.bf16.gmra.mxu1 %vm478_vm14, %v809_v45  ;;  %v1034_v54 = vpop.permute.xlu1 %380  ;;  %v1036_v55 = vpop.permute.xlu0 %385 }
  0xa7   : > { %562 = vmatprep.mubr.bf16.mxu0 %v828_v4  ;;  %602 = vmatprep.mubr.bf16.mxu1 %v828_v4 }
  0xaa   : > { %v1041_v56 = vpop.permute.xlu0 %395 }
  0xae   : > { %730 = vmatmul.mubr.msk.bf16.gmra.mxu0 %vm478_vm14, %v810_v46  ;;  %734 = vmatmul.mubr.msk.bf16.gmra.mxu1 %vm478_vm14, %v811_v47  ;;  %v406_v2 = vpop.permute.xlu0 %405 }
  0xaf   : > { %572 = vmatprep.mubr.bf16.mxu0 %v828_v4  ;;  %612 = vmatprep.mubr.bf16.mxu1 %v828_v4  ;;  %v1038_v4 = vpop.permute.xlu1 %390 }
  0xb2   : > { %v416_v21 = vpop.permute.xlu0 %415 }
  0xb3   : > { %v401_v57 = vpop.permute.xlu1 %400 }
  0xb6   : > { %731 = vmatmul.mubr.msk.bf16.gmra.mxu0 %vm478_vm14, %v812_v48  ;;  %735 = vmatmul.mubr.msk.bf16.gmra.mxu1 %vm478_vm14, %v813_v49  ;;  %v426_v29 = vpop.permute.xlu0 %425 }
  0xb7   : > { %v411_v12 = vpop.permute.xlu1 %410 }
  0xbb   : > { %v421_v31 = vpop.permute.xlu1 %420 }
  0xbf   : > { %v431_v46 = vpop.permute.xlu1 %430 }
 0x15e   : > { %v544_v58 = vpop.f32.mrf.mxu0  ;;  %v584_v59 = vpop.f32.mrf.mxu1 }
 0x15f   : > { %v545_v60 = vadd.f32 %v544_v58, %v361_v51  ;;  %v585_v61 = vadd.f32 %v584_v59, %v401_v57 }
 0x160   : > { %v546_v62 = vpop.f32.mrf.mxu0  ;;  %v586_v63 = vpop.f32.mrf.mxu1 }
 0x161   : > { %623 = vst [vmem:[%s1046_s27] sm:$0xff] %v545_v60  ;;  %639 = vst [vmem:[%s1046_s27 + $0x80] sm:$0xff] %v585_v61  ;;  %v547_v3 = vadd.f32 %v546_v62, %v361_v51  ;;  %v587_v5 = vadd.f32 %v586_v63, %v401_v57  ;;  %v436_v57 = vpop.permute.xlu0 %435 }
 0x162   : > { %v548_v6 = vpop.f32.mrf.mxu0  ;;  %v588_v7 = vpop.f32.mrf.mxu1 }
 0x163   : > { %624 = vst [vmem:[%s1046_s27 + $0x8] sm:$0xff] %v547_v3  ;;  %640 = vst [vmem:[%s1046_s27 + $0x88] sm:$0xff] %v587_v5  ;;  %v549_v8 = vadd.f32 %v548_v6, %v366_v50  ;;  %v589_v9 = vadd.f32 %v588_v7, %v406_v2 }
 0x164   : > { %v550_v10 = vpop.f32.mrf.mxu0  ;;  %v590_v11 = vpop.f32.mrf.mxu1 }
 0x165   : > { %625 = vst [vmem:[%s1046_s27 + $0x10] sm:$0xff] %v549_v8  ;;  %641 = vst [vmem:[%s1046_s27 + $0x90] sm:$0xff] %v589_v9  ;;  %v551_v13 = vadd.f32 %v550_v10, %v366_v50  ;;  %v591_v14 = vadd.f32 %v590_v11, %v406_v2 }
 0x166   : > { %v554_v15 = vpop.f32.mrf.mxu0  ;;  %v594_v16 = vpop.f32.mrf.mxu1 }
 0x167   : > { %626 = vst [vmem:[%s1046_s27 + $0x18] sm:$0xff] %v551_v13  ;;  %642 = vst [vmem:[%s1046_s27 + $0x98] sm:$0xff] %v591_v14  ;;  %v555_v17 = vadd.f32 %v554_v15, %v371_v52  ;;  %v595_v18 = vadd.f32 %v594_v16, %v411_v12 }
 0x168   : > { %v556_v19 = vpop.f32.mrf.mxu0  ;;  %v596_v20 = vpop.f32.mrf.mxu1 }
 0x169   : > { %627 = vst [vmem:[%s1046_s27 + $0x20] sm:$0xff] %v555_v17  ;;  %643 = vst [vmem:[%s1046_s27 + $0xa0] sm:$0xff] %v595_v18  ;;  %v557_v22 = vadd.f32 %v556_v19, %v371_v52  ;;  %v597_v23 = vadd.f32 %v596_v20, %v411_v12 }
 0x16a   : > { %v558_v1 = vpop.f32.mrf.mxu0  ;;  %v598_v24 = vpop.f32.mrf.mxu1 }
 0x16b   : > { %628 = vst [vmem:[%s1046_s27 + $0x28] sm:$0xff] %v557_v22  ;;  %644 = vst [vmem:[%s1046_s27 + $0xa8] sm:$0xff] %v597_v23  ;;  %v559_v25 = vadd.f32 %v558_v1, %v376_v53  ;;  %v599_v26 = vadd.f32 %v598_v24, %v416_v21 }
 0x16c   : > { %v560_v27 = vpop.f32.mrf.mxu0  ;;  %v600_v30 = vpop.f32.mrf.mxu1 }
 0x16d   : > { %629 = vst [vmem:[%s1046_s27 + $0x30] sm:$0xff] %v559_v25  ;;  %645 = vst [vmem:[%s1046_s27 + $0xb0] sm:$0xff] %v599_v26  ;;  %v561_v32 = vadd.f32 %v560_v27, %v376_v53  ;;  %v601_v33 = vadd.f32 %v600_v30, %v416_v21 }
 0x16e   : > { %v564_v36 = vpop.f32.mrf.mxu0  ;;  %v604_v37 = vpop.f32.mrf.mxu1 }
 0x16f   : > { %630 = vst [vmem:[%s1046_s27 + $0x38] sm:$0xff] %v561_v32  ;;  %646 = vst [vmem:[%s1046_s27 + $0xb8] sm:$0xff] %v601_v33  ;;  %v565_v38 = vadd.f32 %v564_v36, %v1034_v54  ;;  %v605_v39 = vadd.f32 %v604_v37, %v421_v31 }
 0x170   : > { %v566_v40 = vpop.f32.mrf.mxu0  ;;  %v606_v0 = vpop.f32.mrf.mxu1 }
 0x171   : > { %631 = vst [vmem:[%s1046_s27 + $0x40] sm:$0xff] %v565_v38  ;;  %647 = vst [vmem:[%s1046_s27 + $0xc0] sm:$0xff] %v605_v39  ;;  %v567_v41 = vadd.f32 %v566_v40, %v1034_v54  ;;  %v607_v42 = vadd.f32 %v606_v0, %v421_v31 }
 0x172   : > { %v568_v35 = vpop.f32.mrf.mxu0  ;;  %v608_v43 = vpop.f32.mrf.mxu1 }
 0x173   : > { %632 = vst [vmem:[%s1046_s27 + $0x48] sm:$0xff] %v567_v41  ;;  %648 = vst [vmem:[%s1046_s27 + $0xc8] sm:$0xff] %v607_v42  ;;  %v569_v34 = vadd.f32 %v568_v35, %v1036_v55  ;;  %v609_v28 = vadd.f32 %v608_v43, %v426_v29 }
 0x174   : > { %v570_v44 = vpop.f32.mrf.mxu0  ;;  %v610_v45 = vpop.f32.mrf.mxu1 }
 0x175   : > { %633 = vst [vmem:[%s1046_s27 + $0x50] sm:$0xff] %v569_v34  ;;  %649 = vst [vmem:[%s1046_s27 + $0xd0] sm:$0xff] %v609_v28  ;;  %v571_v47 = vadd.f32 %v570_v44, %v1036_v55  ;;  %v611_v48 = vadd.f32 %v610_v45, %v426_v29 }
 0x176   : > { %v574_v49 = vpop.f32.mrf.mxu0  ;;  %v614_v50 = vpop.f32.mrf.mxu1 }
 0x177   : > { %634 = vst [vmem:[%s1046_s27 + $0x58] sm:$0xff] %v571_v47  ;;  %650 = vst [vmem:[%s1046_s27 + $0xd8] sm:$0xff] %v611_v48  ;;  %v575_v51 = vadd.f32 %v574_v49, %v1038_v4  ;;  %v615_v52 = vadd.f32 %v614_v50, %v431_v46 }
 0x178   : > { %v576_v53 = vpop.f32.mrf.mxu0  ;;  %v616_v54 = vpop.f32.mrf.mxu1 }
 0x179   : > { %635 = vst [vmem:[%s1046_s27 + $0x60] sm:$0xff] %v575_v51  ;;  %651 = vst [vmem:[%s1046_s27 + $0xe0] sm:$0xff] %v615_v52  ;;  %v577_v55 = vadd.f32 %v576_v53, %v1038_v4  ;;  %v617_v58 = vadd.f32 %v616_v54, %v431_v46 }
 0x17a   : > { %v578_v59 = vpop.f32.mrf.mxu0  ;;  %v618_v60 = vpop.f32.mrf.mxu1 }
 0x17b   : > { %636 = vst [vmem:[%s1046_s27 + $0x68] sm:$0xff] %v577_v55  ;;  %652 = vst [vmem:[%s1046_s27 + $0xe8] sm:$0xff] %v617_v58  ;;  %v579_v61 = vadd.f32 %v578_v59, %v1041_v56  ;;  %v619_v62 = vadd.f32 %v618_v60, %v436_v57 }
 0x17c   : > { %v580_v63 = vpop.f32.mrf.mxu0  ;;  %v620_v2 = vpop.f32.mrf.mxu1 }
 0x17d   : > { %637 = vst [vmem:[%s1046_s27 + $0x70] sm:$0xff] %v579_v61  ;;  %653 = vst [vmem:[%s1046_s27 + $0xf0] sm:$0xff] %v619_v62  ;;  %v581_v3 = vadd.f32 %v580_v63, %v1041_v56  ;;  %v621_v5 = vadd.f32 %v620_v2, %v436_v57 }
 0x17f   : > { %638 = vst [vmem:[%s1046_s27 + $0x78] sm:$0xff] %v581_v3  ;;  %654 = vst [vmem:[%s1046_s27 + $0xf8] sm:$0xff] %v621_v5 }
 0x180 PF: > { %s13_s12 = sadd.s32 1, %s820_s12  }
 0x181   : > { %p10_p4 = scmp.ge.s32.totalorder %s13_s12, 18  }
 0x183   :  { %12 = sbr.rel (!%p10_p4) target bundleno = 1 (0x1), region = 62 }

// kernel: convlstm_pallas.3
= control target key start
LH: loop header
LB: loop body
LE: loop exit
PB: predicated region body
PF: predicated region fallthrough
CT: control target
= control target key end

     0   :  { %s1975_s9 = smov 0   ;;  %s1977_s10 = smov 0   ;;  %s2392_s0 = inlined_call_operand.vmem [shape: f32[2,8,128,256], index: 0, kind: input, shape index: {}]   ;;  %s2393_s1 = inlined_call_operand.vmem [shape: bf16[128,288], index: 1, kind: input, shape index: {}]   ;;  %s2394_s2 = inlined_call_operand.vmem [shape: f32[2,8,32,256], index: 2, kind: output, shape index: {}]  }
   0x1   :  { %s1979_s11 = smov 0   ;;  %s1981_s12 = smov 0  }
   0x2   :  { %s1983_s13 = smov 0  }
   0x3 LB: > { %s21_s14 = sadd.s32 1, %s1940_s11  ;;  %s24_s15 = sadd.s32 1, %s1944_s12  ;;  %s1948_s13 = sphi %s1983_s13, %s12_s13   ;;  %s1944_s12 = sphi %s1981_s12, %s2414_s12   ;;  %s1940_s11 = sphi %s1979_s11, %s2413_s11   ;;  %s1936_s10 = sphi %s1977_s10, %s2412_s10   ;;  %s1932_s9 = sphi %s1975_s9, %s2411_s9  }
   0x4   : > { %p22_p0 = scmp.ge.s32.totalorder %s21_s14, 8  ;;  %p1386_p1 = scmp.ge.s32.totalorder %s1948_s13, 1 }
   0x5   : > { %p132_p2 = scmp.lt.s32.totalorder %s1948_s13, 17 }
   0x6   : > { %s2416_s14 = smov (%p22_p0, %s21_s14), 0  ;;  %s2418_s15 = smov (!%p22_p0, %s24_s15), %s1944_s12 }
   0x7   : > { %p133_p3 = pnand %p1386_p1, %p132_p2  ;;  %p26_p4 = scmp.ge.s32.totalorder %s2418_s15, 2 }
   0x8   : > { %p162_p5 = scmp.lt.s32.totalorder (!%p133_p3), %s1936_s10, 1  ;;  %p164_p6 = scmp.lt.s32.totalorder (!%p133_p3), %s1932_s9, 7 }
   0x9   : > { %s2420_s15 = smov (%p26_p4, %s2418_s15), 0  ;;  %136 = sbr.rel (%p133_p3) target bundleno = 524 (0x20c), region = 28 }
   0xa   : > { %p1393_p7 = scmp.ne.s32.totalorder (!%p133_p3), %s1932_s9, 0 }
   0xe   : > { %s2422_s10 = smov (!%p162_p5, %s1936_s10), 1 }
   0xf   : > { %s165_s16 = scalar_select %p164_p6, %s1932_s9, 7 }
  0x10   : > { %s1388_s17 = sshll.u32 %s2422_s10, 8  ;;  %s1391_s18 = sshll.u32 %s2422_s10, 6 }
  0x11   : > { %s1387_s19 = sshll.u32 %s165_s16, 5  ;;  %s1390_s20 = sshll.u32 %s165_s16, 3 }
  0x12   : > { %s168_s21 = sadd.s32 %s1388_s17, %s1387_s19  ;;  %s177_s22 = sadd.s32 %s1391_s18, %s1390_s20 }
  0x13   : > { %s1389_s23 = sshll.u32 %s168_s21, 3  ;;  %s1392_s24 = sshll.u32 %s177_s22, 3 }
  0x14   : > { %s2012_s27 = scalar_lea.vmem %s2392_s0, %s1389_s23  ;;  %s2017_s30 = scalar_lea.vmem %s2394_s2, %s1392_s24 }
  0x15   : > { %184 = sbr.rel (%p1393_p7) target bundleno = 35 (0x23), region = 32 }
  0x1a   : > { %v1950_v0 = vmov 0.0  }
  0x1b   : > { %185 = vst [vmem:[#allocation2 + $0x30] sm:$0xff] %v1950_v0  ;;  %186 = vst [vmem:[#allocation2] sm:$0xff] %v1950_v0 }
  0x1c   : > { %187 = vst [vmem:[#allocation2 + $0x18] sm:$0xff] %v1950_v0  ;;  %188 = vst [vmem:[#allocation2 + $0x10] sm:$0xff] %v1950_v0 }
  0x1d   : > { %189 = vst [vmem:[#allocation2 + $0x8] sm:$0xff] %v1950_v0  ;;  %190 = vst [vmem:[#allocation2 + $0x20] sm:$0xff] %v1950_v0 }
  0x1e   : > { %191 = vst [vmem:[#allocation2 + $0x28] sm:$0xff] %v1950_v0  ;;  %192 = vst [vmem:[#allocation2 + $0x38] sm:$0xff] %v1950_v0 }
  0x1f   : > { %193 = vst [vmem:[#allocation3] sm:$0xff] %v1950_v0  ;;  %194 = vst [vmem:[#allocation3 + $0x18] sm:$0xff] %v1950_v0 }
  0x20   : > { %195 = vst [vmem:[#allocation3 + $0x10] sm:$0xff] %v1950_v0  ;;  %196 = vst [vmem:[#allocation3 + $0x20] sm:$0xff] %v1950_v0 }
  0x21   : > { %197 = vst [vmem:[#allocation3 + $0x28] sm:$0xff] %v1950_v0  ;;  %198 = vst [vmem:[#allocation3 + $0x8] sm:$0xff] %v1950_v0 }
  0x22   : > { %199 = vst [vmem:[#allocation3 + $0x30] sm:$0xff] %v1950_v0  ;;  %200 = vst [vmem:[#allocation3 + $0x38] sm:$0xff] %v1950_v0 }
  0x23 PF: > { %v2024_v3 = vld [vmem:[#allocation2 + $0x30] sm:$0xff]  ;;  %v2028_v5 = vld [vmem:[#allocation2] sm:$0xff]  ;;  %v2036_v9 = vld [vmem:[#allocation2 + $0x18] sm:$0xff]  ;;  %s1951_s3 = smov 1   ;;  %s1952_s4 = smov 15   ;;  %v1958_v17 = vmov 0   ;;  %v209_v19 = vlaneseq }
  0x24   : > { %v2020_v1 = vld [vmem:[#allocation2 + $0x8] sm:$0xff]  ;;  %v2022_v2 = vld [vmem:[#allocation2 + $0x20] sm:$0xff]  ;;  %v1600_v8 = vpack.i.bf16 %v2028_v5, %v2024_v3  ;;  %v2038_v10 = vld [vmem:[#allocation2 + $0x10] sm:$0xff]  ;;  %s1953_s5 = smov 16   ;;  %s1954_s6 = smov 17   ;;  %v1705_v16 = vpack.i.bf16 %v2036_v9, %v2024_v3  ;;  %950 = vmatprep.mubr.bf16.mxu1 %v1958_v17  ;;  %vm379_vm0 = vcmask 7168  }
  0x25   : > { %v1590_v4 = vpack.i.bf16 %v2022_v2, %v2020_v1  ;;  %v2030_v6 = vld [vmem:[#allocation2 + $0x28] sm:$0xff]  ;;  %v2032_v7 = vld [vmem:[#allocation2 + $0x38] sm:$0xff]  ;;  %v1605_v12 = vpack.i.bf16 %v2038_v10, %v2036_v9  ;;  %s1955_s7 = smov 112   ;;  %s1956_s8 = smov 113   ;;  %v1700_v15 = vpack.i.bf16 %v2038_v10, %v2028_v5  ;;  %v1753_v18 = vld [vmem:[%s2393_s1 + $0x4] ss:$12 sps:$4 sm:$0xff]  }
  0x26   : > { %v1595_v11 = vpack.i.bf16 %v2032_v7, %v2030_v6  ;;  %1601 = vrot.lane.b32.xlu1 %v1600_v8, %s1951_s3  ;;  %v1690_v13 = vpack.i.bf16 %v2032_v7, %v2022_v2  ;;  %v1695_v14 = vpack.i.bf16 %v2030_v6, %v2020_v1  ;;  %s1957_s9 = smov 127   ;;  %s1959_s10 = smov 111   ;;  %837 = vmatprep.mubr.bf16.mxu0 %v1753_v18  ;;  %v210_v20 = vand.u32 127, %v209_v19 }
  0x27   : > { %1591 = vrot.lane.b32.xlu0 %v1590_v4, %s1951_s3  ;;  %vm336_vm4 = vcmask 121856   ;;  %vm303_vm10 = vcmask 130048   ;;  %vm260_vm12 = vcmask 138240   ;;  %vm502_vm14 = vcmask 916480  }
  0x28   : > { %v211_v21 = vadd.s32 128, %v210_v20  ;;  %v216_v25 = vand.u32 15, %v210_v20  ;;  %vm2119_vm11 = vmneg %vm303_vm10 }
  0x29   : > { %vm1444_vm13 = vmpackc.low %vm2119_vm11, %vm2119_vm11 }
  0x2a   : > { %1606 = vrot.lane.b32.xlu1 %v1605_v12, %s1951_s3  ;;  %v223_v23 = vand.u32 15, %v211_v21  ;;  %vm277_vm2 = vcmp.ne.s32.totalorder %v216_v25, 0  ;;  %vm2086_vm7 = vcmp.ne.s32.totalorder %v216_v25, 15  ;;  %vm2158_vm15 = vmpackc.low %vm502_vm14, %vm502_vm14  ;;  %v1761_v21 = vld [vmem:[%s2393_s1 + $0x30] ss:$12 sps:$4 sm:$0xff]  }
  0x2b   : > { %1596 = vrot.lane.b32.xlu0 %v1595_v11, %s1951_s3  ;;  %vm2066_vm5 = vmpackc.low %vm277_vm2, %vm277_vm2  ;;  %vm535_vm2 = vcmask 908288  }
  0x2c   : > { %vm278_vm1 = vcmp.ne.s32.totalorder %v223_v23, 0  ;;  %vm2071_vm6 = vcmp.ne.s32.totalorder %v223_v23, 15  ;;  %vm2108_vm9 = vmpackc.low %vm2086_vm7, %vm2086_vm7 }
  0x2d   : > { %vm2061_vm3 = vmpackc.low %vm278_vm1, %vm278_vm1  ;;  %vm420_vm1 = vcmask 1039360  }
  0x2e   : > { %1616 = vrot.lane.b32.xlu1 %v1595_v11, %s1952_s4  ;;  %vm2093_vm8 = vmpackc.low %vm2071_vm6, %vm2071_vm6 }
  0x2f   : > { %1611 = vrot.lane.b32.xlu0 %v1590_v4, %s1952_s4 }
  0x32   : > { %1626 = vrot.lane.b32.xlu1 %v1605_v12, %s1952_s4 }
  0x33   : > { %1621 = vrot.lane.b32.xlu0 %v1600_v8, %s1952_s4 }
  0x36   : > { %1636 = vrot.lane.b32.xlu1 %v1595_v11, %s1953_s5 }
  0x37   : > { %1631 = vrot.lane.b32.xlu0 %v1590_v4, %s1953_s5 }
  0x3a   : > { %1646 = vrot.lane.b32.xlu1 %v1605_v12, %s1953_s5 }
  0x3b   : > { %1641 = vrot.lane.b32.xlu0 %v1600_v8, %s1953_s5 }
  0x3e   : > { %1656 = vrot.lane.b32.xlu1 %v1595_v11, %s1954_s6 }
  0x3f   : > { %1651 = vrot.lane.b32.xlu0 %v1590_v4, %s1954_s6 }
  0x42   : > { %1666 = vrot.lane.b32.xlu1 %v1605_v12, %s1954_s6 }
  0x43   : > { %1661 = vrot.lane.b32.xlu0 %v1600_v8, %s1954_s6 }
  0x46   : > { %1676 = vrot.lane.b32.xlu1 %v1595_v11, %s1955_s7  ;;  %v1758_v11 = vld [vmem:[%s2393_s1 + $0x38] ss:$12 sps:$4 sm:$0xff]  }
  0x47   : > { %1671 = vrot.lane.b32.xlu0 %v1590_v4, %s1955_s7 }
  0x4a   : > { %1686 = vrot.lane.b32.xlu1 %v1605_v12, %s1955_s7 }
  0x4b   : > { %1681 = vrot.lane.b32.xlu0 %v1600_v8, %s1955_s7 }
  0x4e   : > { %1696 = vrot.lane.b32.xlu1 %v1695_v14, %s1956_s8 }
  0x4f   : > { %1691 = vrot.lane.b32.xlu0 %v1690_v13, %s1956_s8 }
  0x52   : > { %1706 = vrot.lane.b32.xlu1 %v1705_v16, %s1956_s8 }
  0x53   : > { %1701 = vrot.lane.b32.xlu0 %v1700_v15, %s1956_s8 }
  0x56   : > { %1716 = vrot.lane.b32.xlu1 %v1695_v14, %s1957_s9 }
  0x57   : > { %1711 = vrot.lane.b32.xlu0 %v1690_v13, %s1957_s9 }
  0x5a   : > { %1726 = vrot.lane.b32.xlu1 %v1705_v16, %s1957_s9 }
  0x5b   : > { %1721 = vrot.lane.b32.xlu0 %v1700_v15, %s1957_s9 }
  0x5e   : > { %1736 = vrot.lane.b32.xlu1 %v1695_v14, %s1959_s10 }
  0x5f   : > { %1731 = vrot.lane.b32.xlu0 %v1690_v13, %s1959_s10 }
  0x62   : > { %1746 = vrot.lane.b32.xlu1 %v1705_v16, %s1959_s10 }
  0x63   : > { %1741 = vrot.lane.b32.xlu0 %v1700_v15, %s1959_s10 }
  0x98   : > { %v1602_v24 = vpop.permute.xlu1 %1601 }
  0x99   : > { %v1592_v22 = vpop.permute.xlu0 %1591  ;;  %v1604_v28 = vunpack.i.h.bf16 %v1602_v24  ;;  %v1603_v29 = vunpack.i.l.bf16 %v1602_v24 }
  0x9a   : > { %v1593_v26 = vunpack.i.l.bf16 %v1592_v22  ;;  %v1594_v27 = vunpack.i.h.bf16 %v1592_v22 }
  0x9b   : > { %v380_v37 = vsel %vm379_vm0, %v1603_v29, %v1604_v28  ;;  %v392_v47 = vsel %vm379_vm0, 0.0, %v1603_v29 }
  0x9c   : > { %v1607_v33 = vpop.permute.xlu1 %1606  ;;  %v394_v34 = vsel %vm379_vm0, 0.0, %v1593_v26  ;;  %v382_v39 = vsel %vm379_vm0, %v1593_v26, %v1594_v27 }
  0x9d   : > { %v1597_v30 = vpop.permute.xlu0 %1596  ;;  %v1609_v35 = vunpack.i.h.bf16 %v1607_v33  ;;  %v1608_v36 = vunpack.i.l.bf16 %v1607_v33 }
  0x9e   : > { %v1599_v31 = vunpack.i.h.bf16 %v1597_v30  ;;  %v1598_v32 = vunpack.i.l.bf16 %v1597_v30 }
  0x9f   : > { %v381_v42 = vsel %vm379_vm0, %v1608_v36, %v1609_v35  ;;  %v393_v52 = vsel %vm379_vm0, 0.0, %v1608_v36 }
  0xa0   : > { %v395_v38 = vsel %vm379_vm0, 0.0, %v1598_v32  ;;  %v383_v40 = vsel %vm379_vm0, %v1598_v32, %v1599_v31  ;;  %v1617_v50 = vpop.permute.xlu1 %1616  ;;  %v1425_v53 = vpack.c.bf16 %v381_v42, %v380_v37  ;;  %v1428_v62 = vpack.c.bf16 %v393_v52, %v392_v47 }
  0xa1   : > { %v1612_v43 = vpop.permute.xlu0 %1611  ;;  %v1419_v44 = vpack.c.bf16 %v383_v40, %v382_v39  ;;  %v1422_v46 = vpack.c.bf16 %v395_v38, %v394_v34  ;;  %v1619_v54 = vunpack.i.h.bf16 %v1617_v50  ;;  %v1618_v55 = vunpack.i.l.bf16 %v1617_v50 }
  0xa2   : > { %v1614_v48 = vunpack.i.h.bf16 %v1612_v43  ;;  %v1613_v49 = vunpack.i.l.bf16 %v1612_v43  ;;  %vm461_vm0 = vcmask 924672  }
  0xa3   : > { %1420 = vmatprep.subr.msk.bf16.mxu0 %vm2061_vm3, %v1419_v44  ;;  %v340_v58 = vsel %vm336_vm4, %v1618_v55, %v1619_v54  ;;  %v352_v59 = vsel %vm336_vm4, 0.0, %v1618_v55 }
  0xa4   : > { %v339_v56 = vsel %vm336_vm4, %v1613_v49, %v1614_v48  ;;  %1423 = vmatpush1.bf16.msk.msra.mxu0 %vm2066_vm5, %v1422_v46  ;;  %v351_v57 = vsel %vm336_vm4, 0.0, %v1613_v49  ;;  %v1627_v8 = vpop.permute.xlu1 %1626 }
  0xa5   : > { %v1622_v60 = vpop.permute.xlu0 %1621  ;;  %1426 = vmatprep.subr.msk.bf16.mxu0 %vm2061_vm3, %v1425_v53  ;;  %v1431_v63 = vpack.c.bf16 %v340_v58, %v339_v56  ;;  %v1629_v12 = vunpack.i.h.bf16 %v1627_v8  ;;  %v1628_v13 = vunpack.i.l.bf16 %v1627_v8  ;;  %v1434_v14 = vpack.c.bf16 %v352_v59, %v351_v57 }
  0xa6   : > { %v1624_v0 = vunpack.i.h.bf16 %v1622_v60  ;;  %v1623_v4 = vunpack.i.l.bf16 %v1622_v60 }
  0xa7   : > { %v338_v18 = vsel %vm336_vm4, %v1628_v13, %v1629_v12  ;;  %v350_v19 = vsel %vm336_vm4, 0.0, %v1628_v13 }
  0xa8   : > { %v337_v15 = vsel %vm336_vm4, %v1623_v4, %v1624_v0  ;;  %1429 = vmatpush1.bf16.msk.msra.mxu0 %vm2066_vm5, %v1428_v62  ;;  %v349_v16 = vsel %vm336_vm4, 0.0, %v1623_v4  ;;  %v1637_v25 = vpop.permute.xlu1 %1636 }
  0xa9   : > { %v1632_v20 = vpop.permute.xlu0 %1631  ;;  %1432 = vmatprep.subr.msk.bf16.mxu0 %vm2093_vm8, %v1431_v63  ;;  %v1437_v22 = vpack.c.bf16 %v338_v18, %v337_v15  ;;  %v1639_v26 = vunpack.i.h.bf16 %v1637_v25  ;;  %v1638_v27 = vunpack.i.l.bf16 %v1637_v25  ;;  %v1440_v28 = vpack.c.bf16 %v350_v19, %v349_v16 }
  0xaa   : > { %v1634_v23 = vunpack.i.h.bf16 %v1632_v20  ;;  %v1633_v24 = vunpack.i.l.bf16 %v1632_v20 }
  0xab   : > { %v307_v31 = vsel %vm303_vm10, %v1638_v27, %v1639_v26 }
  0xac   : > { %1435 = vmatpush1.bf16.msk.msra.mxu0 %vm2108_vm9, %v1434_v14  ;;  %v306_v29 = vsel %vm303_vm10, %v1633_v24, %v1634_v23  ;;  %v1647_v34 = vpop.permute.xlu1 %1646  ;;  %v1445_v43 = vpack.c.bf16 %v1638_v27, %v1633_v24 }
  0xad   : > { %v1642_v30 = vpop.permute.xlu0 %1641  ;;  %1438 = vmatprep.subr.msk.bf16.mxu0 %vm2093_vm8, %v1437_v22  ;;  %v567_v35 = vpack.c.bf16 %v307_v31, %v306_v29  ;;  %v1649_v37 = vunpack.i.h.bf16 %v1647_v34  ;;  %v1648_v38 = vunpack.i.l.bf16 %v1647_v34 }
  0xae   : > { %v1644_v32 = vunpack.i.h.bf16 %v1642_v30  ;;  %v1643_v33 = vunpack.i.l.bf16 %v1642_v30 }
  0xaf   : > { %v305_v42 = vsel %vm303_vm10, %v1648_v38, %v1649_v37 }
  0xb0   : > { %1441 = vmatpush1.bf16.msk.msra.mxu0 %vm2108_vm9, %v1440_v28  ;;  %v304_v39 = vsel %vm303_vm10, %v1643_v33, %v1644_v32  ;;  %v1657_v47 = vpop.permute.xlu1 %1656  ;;  %v1450_v56 = vpack.c.bf16 %v1648_v38, %v1643_v33 }
  0xb1   : > { %v1652_v40 = vpop.permute.xlu0 %1651  ;;  %813 = vmatprep.subr.bf16.mxu0 %v567_v35  ;;  %v565_v48 = vpack.c.bf16 %v305_v42, %v304_v39  ;;  %v1659_v49 = vunpack.i.h.bf16 %v1657_v47  ;;  %v1658_v50 = vunpack.i.l.bf16 %v1657_v47 }
  0xb2   : > { %v1654_v44 = vunpack.i.h.bf16 %v1652_v40  ;;  %v1653_v46 = vunpack.i.l.bf16 %v1652_v40 }
  0xb3   : > { %v264_v53 = vsel %vm260_vm12, %v1658_v50, %v1659_v49  ;;  %v276_v54 = vsel %vm260_vm12, 0.0, %v1658_v50 }
  0xb4   : > { %v263_v51 = vsel %vm260_vm12, %v1653_v46, %v1654_v44  ;;  %1446 = vmatpush1.bf16.msk.msra.mxu0 %vm1444_vm13, %v1445_v43  ;;  %v275_v52 = vsel %vm260_vm12, 0.0, %v1653_v46  ;;  %v1667_v60 = vpop.permute.xlu1 %1666 }
  0xb5   : > { %v1662_v55 = vpop.permute.xlu0 %1661  ;;  %815 = vmatprep.subr.bf16.mxu0 %v565_v48  ;;  %v1453_v57 = vpack.c.bf16 %v264_v53, %v263_v51  ;;  %v1669_v61 = vunpack.i.h.bf16 %v1667_v60  ;;  %v1668_v62 = vunpack.i.l.bf16 %v1667_v60  ;;  %v1456_v63 = vpack.c.bf16 %v276_v54, %v275_v52 }
  0xb6   : > { %v1664_v58 = vunpack.i.h.bf16 %v1662_v55  ;;  %v1663_v59 = vunpack.i.l.bf16 %v1662_v55 }
  0xb7   : > { %v262_v8 = vsel %vm260_vm12, %v1668_v62, %v1669_v61  ;;  %v274_v12 = vsel %vm260_vm12, 0.0, %v1668_v62 }
  0xb8   : > { %v261_v0 = vsel %vm260_vm12, %v1663_v59, %v1664_v58  ;;  %1451 = vmatpush1.bf16.msk.msra.mxu0 %vm1444_vm13, %v1450_v56  ;;  %v273_v4 = vsel %vm260_vm12, 0.0, %v1663_v59  ;;  %v1677_v18 = vpop.permute.xlu1 %1676 }
  0xb9   : > { %v1672_v13 = vpop.permute.xlu0 %1671  ;;  %1454 = vmatprep.subr.msk.bf16.mxu0 %vm2061_vm3, %v1453_v57  ;;  %v1459_v14 = vpack.c.bf16 %v262_v8, %v261_v0  ;;  %v1679_v19 = vunpack.i.h.bf16 %v1677_v18  ;;  %v1678_v20 = vunpack.i.l.bf16 %v1677_v18  ;;  %v1462_v22 = vpack.c.bf16 %v274_v12, %v273_v4 }
  0xba   : > { %v1674_v15 = vunpack.i.h.bf16 %v1672_v13  ;;  %v1673_v16 = vunpack.i.l.bf16 %v1672_v13 }
  0xbb   : > { %v506_v26 = vsel %vm502_vm14, %v1678_v20, %v1679_v19 }
  0xbc   : > { %1457 = vmatpush1.bf16.msk.msra.mxu0 %vm2066_vm5, %v1456_v63  ;;  %v1465_v23 = vpack.c.bf16 %v1679_v19, %v1674_v15  ;;  %v505_v25 = vsel %vm502_vm14, %v1673_v16, %v1674_v15  ;;  %v1687_v29 = vpop.permute.xlu1 %1686 }
  0xbd   : > { %v1682_v24 = vpop.permute.xlu0 %1681  ;;  %1460 = vmatprep.subr.msk.bf16.mxu0 %vm2061_vm3, %v1459_v14  ;;  %v1689_v31 = vunpack.i.h.bf16 %v1687_v29  ;;  %v1688_v32 = vunpack.i.l.bf16 %v1687_v29  ;;  %v590_v33 = vpack.c.bf16 %v506_v26, %v505_v25 }
  0xbe   : > { %v1684_v27 = vunpack.i.h.bf16 %v1682_v24  ;;  %v1683_v28 = vunpack.i.l.bf16 %v1682_v24 }
  0xbf   : > { %v504_v37 = vsel %vm502_vm14, %v1688_v32, %v1689_v31 }
  0xc0   : > { %1463 = vmatpush1.bf16.msk.msra.mxu0 %vm2066_vm5, %v1462_v22  ;;  %v1468_v34 = vpack.c.bf16 %v1689_v31, %v1684_v27  ;;  %v503_v36 = vsel %vm502_vm14, %v1683_v28, %v1684_v27  ;;  %v1697_v40 = vpop.permute.xlu1 %1696 }
  0xc1   : > { %v1692_v35 = vpop.permute.xlu0 %1691  ;;  %1466 = vmatprep.subr.msk.bf16.mxu0 %vm2158_vm15, %v1465_v23  ;;  %v1699_v42 = vunpack.i.h.bf16 %v1697_v40  ;;  %v1698_v43 = vunpack.i.l.bf16 %v1697_v40  ;;  %v588_v47 = vpack.c.bf16 %v504_v37, %v503_v36 }
  0xc2   : > { %v1694_v38 = vunpack.i.h.bf16 %v1692_v35  ;;  %v1693_v39 = vunpack.i.l.bf16 %v1692_v35 }
  0xc4   : > { %v477_v44 = vsel %vm461_vm0, %v1694_v38, 0.0  ;;  %v476_v46 = vsel %vm461_vm0, %v1693_v39, 0.0  ;;  %822 = vmatpush2.bf16.msra.mxu0 %v590_v33  ;;  %v465_v49 = vsel %vm461_vm0, %v1699_v42, %v1694_v38  ;;  %v464_v50 = vsel %vm461_vm0, %v1698_v43, %v1693_v39  ;;  %v1707_v54 = vpop.permute.xlu1 %1706 }
  0xc5   : > { %v1471_v48 = vpack.c.bf16 %v477_v44, %v476_v46  ;;  %v1702_v51 = vpop.permute.xlu0 %1701  ;;  %1469 = vmatprep.subr.msk.bf16.mxu0 %vm2158_vm15, %v1468_v34  ;;  %v1709_v55 = vunpack.i.h.bf16 %v1707_v54  ;;  %v1708_v56 = vunpack.i.l.bf16 %v1707_v54  ;;  %v1474_v57 = vpack.c.bf16 %v465_v49, %v464_v50 }
  0xc6   : > { %v1704_v52 = vunpack.i.h.bf16 %v1702_v51  ;;  %v1703_v53 = vunpack.i.l.bf16 %v1702_v51 }
  0xc8   : > { %v475_v58 = vsel %vm461_vm0, %v1704_v52, 0.0  ;;  %v474_v59 = vsel %vm461_vm0, %v1703_v53, 0.0  ;;  %824 = vmatpush2.bf16.msra.mxu0 %v588_v47  ;;  %v463_v61 = vsel %vm461_vm0, %v1709_v55, %v1704_v52  ;;  %v462_v62 = vsel %vm461_vm0, %v1708_v56, %v1703_v53  ;;  %v1717_v8 = vpop.permute.xlu1 %1716 }
  0xc9   : > { %v1477_v60 = vpack.c.bf16 %v475_v58, %v474_v59  ;;  %v1712_v63 = vpop.permute.xlu0 %1711  ;;  %1472 = vmatprep.subr.msk.bf16.mxu0 %vm2061_vm3, %v1471_v48  ;;  %v1719_v12 = vunpack.i.h.bf16 %v1717_v8  ;;  %v1718_v13 = vunpack.i.l.bf16 %v1717_v8  ;;  %v1480_v14 = vpack.c.bf16 %v463_v61, %v462_v62  ;;  %v1763_v61 = vld [vmem:[%s2393_s1 + $0x4c] ss:$12 sps:$4 sm:$0xff]   ;;  %v1762_v62 = vld [vmem:[%s2393_s1 + $0x50] ss:$12 sps:$4 sm:$0xff]  }
  0xca   : > { %v1714_v0 = vunpack.i.h.bf16 %v1712_v63  ;;  %v1713_v4 = vunpack.i.l.bf16 %v1712_v63  ;;  %v579_v47 = vpack.c.bf16 %v2032_v7, %v2022_v2  ;;  %v578_v2 = vpack.c.bf16 %v2030_v6, %v2020_v1  ;;  %v1755_v6 = vld [vmem:[%s2393_s1 + $0x1c] ss:$12 sps:$4 sm:$0xff]   ;;  %v1769_v8 = vld [vmem:[%s2393_s1 + $0x60] ss:$12 sps:$4 sm:$0xff]  }
  0xcb   : > { %v577_v58 = vpack.c.bf16 %v2038_v10, %v2028_v5  ;;  %v576_v1 = vpack.c.bf16 %v2036_v9, %v2024_v3  ;;  %v1751_v5 = vld [vmem:[%s2393_s1] ss:$12 sps:$4 sm:$0xff]   ;;  %v1757_v3 = vld [vmem:[%s2393_s1 + $0x18] ss:$12 sps:$4 sm:$0xff]   ;;  %v1765_v63 = vld [vmem:[%s2393_s1 + $0x48] ss:$12 sps:$4 sm:$0xff]  }
  0xcc   : > { %v436_v15 = vsel %vm420_vm1, %v1714_v0, 0.0  ;;  %v435_v16 = vsel %vm420_vm1, %v1713_v4, 0.0  ;;  %1475 = vmatpush2.bf16.msk.msra.mxu0 %vm2066_vm5, %v1474_v57  ;;  %v424_v19 = vsel %vm420_vm1, %v1719_v12, %v1714_v0  ;;  %v423_v20 = vsel %vm420_vm1, %v1718_v13, %v1713_v4  ;;  %v1727_v25 = vpop.permute.xlu1 %1726  ;;  %v1754_v10 = vld [vmem:[%s2393_s1 + $0x20] ss:$12 sps:$4 sm:$0xff]   ;;  %v1767_v0 = vld [vmem:[%s2393_s1 + $0x64] ss:$12 sps:$4 sm:$0xff]  }
  0xcd   : > { %v1483_v18 = vpack.c.bf16 %v436_v15, %v435_v16  ;;  %v1722_v22 = vpop.permute.xlu0 %1721  ;;  %1478 = vmatprep.subr.msk.bf16.mxu0 %vm2061_vm3, %v1477_v60  ;;  %v1729_v26 = vunpack.i.h.bf16 %v1727_v25  ;;  %v1728_v27 = vunpack.i.l.bf16 %v1727_v25  ;;  %v1486_v28 = vpack.c.bf16 %v424_v19, %v423_v20  ;;  %v1750_v60 = vld [vmem:[%s2393_s1 + $0x8] ss:$12 sps:$4 sm:$0xff]   ;;  %v1770_v13 = vld [vmem:[%s2393_s1 + $0x80] ss:$12 sps:$4 sm:$0xff]   ;;  %v1774_v16 = vld [vmem:[%s2393_s1 + $0x98] ss:$12 sps:$4 sm:$0xff]  }
  0xce   : > { %v1724_v23 = vunpack.i.h.bf16 %v1722_v22  ;;  %v1723_v24 = vunpack.i.l.bf16 %v1722_v22  ;;  %vm780_vm3 = vcmask 261120   ;;  %v1759_v9 = vld [vmem:[%s2393_s1 + $0x34] ss:$12 sps:$4 sm:$0xff]   ;;  %v1771_v12 = vld [vmem:[%s2393_s1 + $0x7c] ss:$12 sps:$4 sm:$0xff]  }
  0xcf   : > { %v1766_v4 = vld [vmem:[%s2393_s1 + $0x68] ss:$12 sps:$4 sm:$0xff]   ;;  %v1779_v19 = vld [vmem:[%s2393_s1 + $0xac] ss:$12 sps:$4 sm:$0xff]   ;;  %v1778_v20 = vld [vmem:[%s2393_s1 + $0xb0] ss:$12 sps:$4 sm:$0xff]  }
  0xd0   : > { %v434_v29 = vsel %vm420_vm1, %v1724_v23, 0.0  ;;  %v433_v30 = vsel %vm420_vm1, %v1723_v24, 0.0  ;;  %1481 = vmatpush2.bf16.msk.msra.mxu0 %vm2066_vm5, %v1480_v14  ;;  %v422_v32 = vsel %vm420_vm1, %v1729_v26, %v1724_v23  ;;  %v421_v33 = vsel %vm420_vm1, %v1728_v27, %v1723_v24  ;;  %v1737_v36 = vpop.permute.xlu1 %1736  ;;  %v1773_v14 = vld [vmem:[%s2393_s1 + $0x78] ss:$12 sps:$4 sm:$0xff]   ;;  %v1775_v15 = vld [vmem:[%s2393_s1 + $0x94] ss:$12 sps:$4 sm:$0xff]  }
  0xd1   : > { %v1489_v31 = vpack.c.bf16 %v434_v29, %v433_v30  ;;  %v1732_v41 = vpop.permute.xlu0 %1731  ;;  %1484 = vmatprep.subr.msk.bf16.mxu0 %vm2093_vm8, %v1483_v18  ;;  %v1739_v37 = vunpack.i.h.bf16 %v1737_v36  ;;  %v1738_v38 = vunpack.i.l.bf16 %v1737_v36  ;;  %v1492_v39 = vpack.c.bf16 %v422_v32, %v421_v33  ;;  %v1777_v18 = vld [vmem:[%s2393_s1 + $0x90] ss:$12 sps:$4 sm:$0xff]   ;;  %v1781_v22 = vld [vmem:[%s2393_s1 + $0xa8] ss:$12 sps:$4 sm:$0xff]  }
  0xd2   : > { %v1734_v34 = vunpack.i.h.bf16 %v1732_v41  ;;  %v1733_v35 = vunpack.i.l.bf16 %v1732_v41 }
  0xd4   : > { %1487 = vmatpush2.bf16.msk.msra.mxu0 %vm2108_vm9, %v1486_v28  ;;  %v550_v45 = vsel %vm535_vm2, %v1733_v35, 0.0  ;;  %v551_v40 = vsel %vm535_vm2, %v1734_v34, 0.0  ;;  %v538_v44 = vsel %vm535_vm2, %v1738_v38, %v1733_v35  ;;  %v539_v46 = vsel %vm535_vm2, %v1739_v37, %v1734_v34  ;;  %v1747_v50 = vpop.permute.xlu1 %1746  ;;  %v597_v34 = vld [vmem:[%s2012_s27 + $0x8] sm:$0xff]  ;;  %v598_v37 = vld [vmem:[%s2012_s27 + $0x10] sm:$0xff] }
  0xd5   : > { %v1742_v42 = vpop.permute.xlu0 %1741  ;;  %1490 = vmatprep.subr.msk.bf16.mxu0 %vm2093_vm8, %v1489_v31  ;;  %v1495_v43 = vpack.c.bf16 %v551_v40, %v550_v45  ;;  %v1498_v51 = vpack.c.bf16 %v539_v46, %v538_v44  ;;  %v1749_v52 = vunpack.i.h.bf16 %v1747_v50  ;;  %v1748_v53 = vunpack.i.l.bf16 %v1747_v50  ;;  %v596_v31 = vld [vmem:[%s2012_s27] sm:$0xff]  ;;  %v599_v40 = vld [vmem:[%s2012_s27 + $0x18] sm:$0xff] }
  0xd6   : > { %v1744_v48 = vunpack.i.h.bf16 %v1742_v42  ;;  %v1743_v49 = vunpack.i.l.bf16 %v1742_v42 }
  0xd7   : > { %1496 = vmatprep.subr.msk.bf16.mxu1 %vm2093_vm8, %v1495_v43 }
  0xd8   : > { %v549_v54 = vsel %vm535_vm2, %v1744_v48, 0.0  ;;  %v548_v55 = vsel %vm535_vm2, %v1743_v49, 0.0  ;;  %1493 = vmatpush2.bf16.msk.msra.mxu0 %vm2108_vm9, %v1492_v39  ;;  %1499 = vmatpush1.bf16.msk.msra.mxu1 %vm2108_vm9, %v1498_v51  ;;  %v537_v56 = vsel %vm535_vm2, %v1749_v52, %v1744_v48  ;;  %v536_v57 = vsel %vm535_vm2, %v1748_v53, %v1743_v49  ;;  %v600_v48 = vld [vmem:[%s2012_s27 + $0x20] sm:$0xff]  ;;  %v601_v52 = vld [vmem:[%s2012_s27 + $0x28] sm:$0xff] }
  0xd9   : > { %v1501_v7 = vpack.c.bf16 %v549_v54, %v548_v55  ;;  %833 = vmatprep.subr.bf16.mxu0 %v579_v47  ;;  %v1504_v59 = vpack.c.bf16 %v537_v56, %v536_v57  ;;  %v602_v55 = vld [vmem:[%s2012_s27 + $0x30] sm:$0xff] }
  0xdb   : > { %1502 = vmatprep.subr.msk.bf16.mxu1 %vm2093_vm8, %v1501_v7 }
  0xdc   : > { %834 = vmatpush2.bf16.msra.mxu0 %v578_v2  ;;  %1505 = vmatpush1.bf16.msk.msra.mxu1 %vm2108_vm9, %v1504_v59 }
  0xdd   : > { %835 = vmatprep.subr.bf16.mxu0 %v577_v58 }
  0xdf   : > { %1506 = vmatmul.mubr.msk.bf16.vlgmr.msra.gmra.mxu1 %vm780_vm3, %v1750_v60 }
  0xe0   : > { %836 = vmatpush2.bf16.msra.mxu0 %v576_v1  ;;  %960 = vmatprep.mubr.bf16.mxu1 %v1958_v17 }
  0xe3   : > { %838 = vmatmul.mubr.bf16.vlgmr.msra.gmra.mxu0 %v1751_v5 }
  0xe4   : > { %847 = vmatprep.mubr.bf16.mxu0 %v1755_v6  ;;  %v604_v6 = vld [vmem:[%s2012_s27 + $0x40] sm:$0xff] }
  0xe7   : > { %1507 = vmatmul.mubr.msk.bf16.gmra.mxu1 %vm780_vm3, %v1754_v10 }
  0xe8   : > { %970 = vmatprep.mubr.bf16.mxu1 %v1958_v17 }
  0xeb   : > { %848 = vmatmul.mubr.bf16.gmra.mxu0 %v1757_v3 }
  0xec   : > { %857 = vmatprep.mubr.bf16.mxu0 %v1759_v9 }
  0xef   : > { %1508 = vmatmul.mubr.msk.bf16.gmra.mxu1 %vm780_vm3, %v1758_v11 }
  0xf0   : > { %980 = vmatprep.mubr.bf16.mxu1 %v1958_v17 }
  0xf3   : > { %858 = vmatmul.mubr.bf16.gmra.mxu0 %v1761_v21  ;;  %v605_v21 = vld [vmem:[%s2012_s27 + $0x48] sm:$0xff] }
  0xf4   : > { %867 = vmatprep.mubr.bf16.mxu0 %v1763_v61 }
  0xf7   : > { %1509 = vmatmul.mubr.msk.bf16.gmra.mxu1 %vm780_vm3, %v1762_v62 }
  0xf8   : > { %990 = vmatprep.mubr.bf16.mxu1 %v1958_v17 }
  0xfb   : > { %868 = vmatmul.mubr.bf16.gmra.mxu0 %v1765_v63 }
  0xfc   : > { %877 = vmatprep.mubr.bf16.mxu0 %v1767_v0 }
  0xff   : > { %1510 = vmatmul.mubr.msk.bf16.gmra.mxu1 %vm780_vm3, %v1766_v4 }
 0x100   : > { %1000 = vmatprep.mubr.bf16.mxu1 %v1958_v17 }
 0x103   : > { %878 = vmatmul.mubr.bf16.gmra.mxu0 %v1769_v8 }
 0x104   : > { %887 = vmatprep.mubr.bf16.mxu0 %v1771_v12 }
 0x107   : > { %1511 = vmatmul.mubr.msk.bf16.gmra.mxu1 %vm780_vm3, %v1770_v13 }
 0x108   : > { %1010 = vmatprep.mubr.bf16.mxu1 %v1958_v17 }
 0x10b   : > { %888 = vmatmul.mubr.bf16.gmra.mxu0 %v1773_v14 }
 0x10c   : > { %897 = vmatprep.mubr.bf16.mxu0 %v1775_v15  ;;  %v606_v15 = vld [vmem:[%s2012_s27 + $0x50] sm:$0xff] }
 0x10f   : > { %1512 = vmatmul.mubr.msk.bf16.gmra.mxu1 %vm780_vm3, %v1774_v16 }
 0x110   : > { %1020 = vmatprep.mubr.bf16.mxu1 %v1958_v17 }
 0x113   : > { %898 = vmatmul.mubr.bf16.gmra.mxu0 %v1777_v18 }
 0x114   : > { %907 = vmatprep.mubr.bf16.mxu0 %v1779_v19  ;;  %v607_v19 = vld [vmem:[%s2012_s27 + $0x58] sm:$0xff] }
 0x117   : > { %1513 = vmatmul.mubr.msk.bf16.gmra.mxu1 %vm780_vm3, %v1778_v20 }
 0x11b   : > { %908 = vmatmul.mubr.bf16.gmra.mxu0 %v1781_v22 }
 0x19f   : > { %v952_v17 = vpop.f32.mrf.mxu1 }
 0x1a1   : > { %v954_v23 = vpop.f32.mrf.mxu1 }
 0x1a3   : > { %v839_v24 = vpop.f32.mrf.mxu0  ;;  %v956_v25 = vpop.f32.mrf.mxu1 }
 0x1a4   : > { %v953_v28 = vadd.f32 %v952_v17, %v839_v24  ;;  %v603_v24 = vld [vmem:[%s2012_s27 + $0x38] sm:$0xff] }
 0x1a5   : > { %v841_v26 = vpop.f32.mrf.mxu0  ;;  %v958_v27 = vpop.f32.mrf.mxu1 }
 0x1a6   : > { %v955_v32 = vadd.f32 %v954_v23, %v841_v26  ;;  %v1031_v36 = vadd.f32 %v953_v28, %v596_v31 }
 0x1a7   : > { %v843_v29 = vpop.f32.mrf.mxu0  ;;  %v962_v30 = vpop.f32.mrf.mxu1 }
 0x1a8   : > { %v957_v35 = vadd.f32 %v956_v25, %v843_v29  ;;  %v1032_v42 = vadd.f32 %v955_v32, %v597_v34  ;;  %v1514_v50 = vmul.f32 -1.442695, %v1031_v36  ;;  %v609_v36 = vld [vmem:[%s2012_s27 + $0x68] sm:$0xff] }
 0x1a9   : > { %v845_v33 = vpop.f32.mrf.mxu0  ;;  %v964_v41 = vpop.f32.mrf.mxu1 }
 0x1aa   : > { %v959_v38 = vadd.f32 %v958_v27, %v845_v33  ;;  %v1033_v47 = vadd.f32 %v957_v35, %v598_v37  ;;  %v1515_v7 = vmul.f32 -1.442695, %v1032_v42  ;;  %1782 = vpow2.f32 %v1514_v50  ;;  %v608_v27 = vld [vmem:[%s2012_s27 + $0x60] sm:$0xff] }
 0x1ab   : > { %v849_v39 = vpop.f32.mrf.mxu0  ;;  %v966_v45 = vpop.f32.mrf.mxu1 }
 0x1ac   : > { %v963_v43 = vadd.f32 %v962_v30, %v849_v39  ;;  %v1034_v51 = vadd.f32 %v959_v38, %v599_v40  ;;  %v1516_v59 = vmul.f32 -1.442695, %v1033_v47  ;;  %1784 = vpow2.f32 %v1515_v7 }
 0x1ad   : > { %v851_v44 = vpop.f32.mrf.mxu0  ;;  %v968_v46 = vpop.f32.mrf.mxu1 }
 0x1ae   : > { %v965_v49 = vadd.f32 %v964_v41, %v851_v44  ;;  %v1035_v56 = vadd.f32 %v963_v43, %v600_v48  ;;  %v1517_v1 = vmul.f32 -1.442695, %v1034_v51  ;;  %1786 = vpow2.f32 %v1516_v59 }
 0x1af   : > { %v853_v53 = vpop.f32.mrf.mxu0  ;;  %v972_v54 = vpop.f32.mrf.mxu1 }
 0x1b0   : > { %v967_v2 = vadd.f32 %v966_v45, %v853_v53  ;;  %v1036_v60 = vadd.f32 %v965_v49, %v601_v52  ;;  %v1518_v11 = vmul.f32 -1.442695, %v1035_v56  ;;  %1788 = vpow2.f32 %v1517_v1 }
 0x1b1   : > { %v855_v57 = vpop.f32.mrf.mxu0  ;;  %v974_v58 = vpop.f32.mrf.mxu1 }
 0x1b2   : > { %v1037_v5 = vadd.f32 %v967_v2, %v602_v55  ;;  %v1519_v63 = vmul.f32 -1.442695, %v1036_v60  ;;  %1790 = vpow2.f32 %v1518_v11  ;;  %v969_v17 = vadd.f32 %v968_v46, %v855_v57  ;;  %v610_v46 = vld [vmem:[%s2012_s27 + $0x70] sm:$0xff] }
 0x1b3   : > { %v859_v10 = vpop.f32.mrf.mxu0  ;;  %v976_v3 = vpop.f32.mrf.mxu1 }
 0x1b4   : > { %v973_v9 = vadd.f32 %v972_v54, %v859_v10  ;;  %v1520_v8 = vmul.f32 -1.442695, %v1037_v5  ;;  %1792 = vpow2.f32 %v1519_v63  ;;  %v1038_v34 = vadd.f32 %v969_v17, %v603_v24 }
 0x1b5   : > { %v861_v61 = vpop.f32.mrf.mxu0  ;;  %v978_v62 = vpop.f32.mrf.mxu1 }
 0x1b6   : > { %v1039_v0 = vadd.f32 %v973_v9, %v604_v6  ;;  %v975_v4 = vadd.f32 %v974_v58, %v861_v61  ;;  %1794 = vpow2.f32 %v1520_v8  ;;  %v1521_v50 = vmul.f32 -1.442695, %v1038_v34  ;;  %v611_v58 = vld [vmem:[%s2012_s27 + $0x78] sm:$0xff]  ;;  %v612_v9 = vld [vmem:[%s2012_s27 + $0x80] sm:$0xff]  ;;  %v613_v8 = vld [vmem:[%s2012_s27 + $0x88] sm:$0xff] }
 0x1b7   : > { %v863_v12 = vpop.f32.mrf.mxu0  ;;  %v982_v13 = vpop.f32.mrf.mxu1 }
 0x1b8   : > { %v1040_v14 = vadd.f32 %v975_v4, %v605_v21  ;;  %v1522_v16 = vmul.f32 -1.442695, %v1039_v0  ;;  %v977_v18 = vadd.f32 %v976_v3, %v863_v12  ;;  %v1783_v40 = vpop.eup %1782 }
 0x1b9   : > { %v865_v20 = vpop.f32.mrf.mxu0  ;;  %v984_v22 = vpop.f32.mrf.mxu1  ;;  %v1087_v52 = vadd.f32 1.0, %v1783_v40 }
 0x1ba   : > { %v979_v23 = vadd.f32 %v978_v62, %v865_v20  ;;  %v1523_v25 = vmul.f32 -1.442695, %v1040_v14  ;;  %v1041_v26 = vadd.f32 %v977_v18, %v606_v15  ;;  %1796 = vpow2.f32 %v1522_v16  ;;  %v1785_v49 = vpop.eup %1784  ;;  %v614_v20 = vld [vmem:[%s2012_s27 + $0x90] sm:$0xff] }
 0x1bb   : > { %v869_v28 = vpop.f32.mrf.mxu0  ;;  %v986_v29 = vpop.f32.mrf.mxu1  ;;  %v1088_v57 = vadd.f32 1.0, %v1785_v49  ;;  %v617_v49 = vld [vmem:[%s2012_s27 + $0xa8] sm:$0xff] }
 0x1bc   : > { %v1042_v30 = vadd.f32 %v979_v23, %v607_v19  ;;  %v983_v31 = vadd.f32 %v982_v13, %v869_v28  ;;  %v1524_v32 = vmul.f32 -1.442695, %v1041_v26  ;;  %1798 = vpow2.f32 %v1523_v25  ;;  %v1787_v51 = vpop.eup %1786  ;;  %v615_v28 = vld [vmem:[%s2012_s27 + $0x98] sm:$0xff] }
 0x1bd   : > { %v871_v33 = vpop.f32.mrf.mxu0  ;;  %v988_v41 = vpop.f32.mrf.mxu1  ;;  %v1089_v5 = vadd.f32 1.0, %v1787_v51 }
 0x1be   : > { %v1043_v35 = vadd.f32 %v983_v31, %v608_v27  ;;  %v1525_v37 = vmul.f32 -1.442695, %v1042_v30  ;;  %v985_v38 = vadd.f32 %v984_v22, %v871_v33  ;;  %1800 = vpow2.f32 %v1524_v32  ;;  %v1789_v55 = vpop.eup %1788 }
 0x1bf   : > { %v873_v39 = vpop.f32.mrf.mxu0  ;;  %v992_v45 = vpop.f32.mrf.mxu1  ;;  %v1090_v3 = vadd.f32 1.0, %v1789_v55 }
 0x1c0   : > { %v987_v42 = vadd.f32 %v986_v29, %v873_v39  ;;  %v1526_v43 = vmul.f32 -1.442695, %v1043_v35  ;;  %v1044_v44 = vadd.f32 %v985_v38, %v609_v36  ;;  %1802 = vpow2.f32 %v1525_v37  ;;  %v1791_v1 = vpop.eup %1790  ;;  %v616_v35 = vld [vmem:[%s2012_s27 + $0xa0] sm:$0xff] }
 0x1c1   : > { %v875_v47 = vpop.f32.mrf.mxu0  ;;  %v994_v48 = vpop.f32.mrf.mxu1  ;;  %v1091_v4 = vadd.f32 1.0, %v1791_v1 }
 0x1c2   : > { %v1527_v2 = vmul.f32 -1.442695, %v1044_v44  ;;  %v1045_v7 = vadd.f32 %v987_v42, %v610_v46  ;;  %v989_v56 = vadd.f32 %v988_v41, %v875_v47  ;;  %1804 = vpow2.f32 %v1526_v43  ;;  %v1793_v10 = vpop.eup %1792 }
 0x1c3   : > { %v879_v53 = vpop.f32.mrf.mxu0  ;;  %v996_v54 = vpop.f32.mrf.mxu1  ;;  %1806 = vpow2.f32 %v1521_v50  ;;  %v1092_v15 = vadd.f32 1.0, %v1793_v10  ;;  %v621_v10 = vld [vmem:[%s2012_s27 + $0xc8] sm:$0xff] }
 0x1c4   : > { %v993_v6 = vadd.f32 %v992_v45, %v879_v53  ;;  %1808 = vrcp.f32 %v1087_v52  ;;  %v1795_v61 = vpop.eup %1794  ;;  %v1528_v62 = vmul.f32 -1.442695, %v1045_v7  ;;  %v1046_v63 = vadd.f32 %v989_v56, %v611_v58 }
 0x1c5   : > { %v881_v59 = vpop.f32.mrf.mxu0  ;;  %v998_v60 = vpop.f32.mrf.mxu1  ;;  %1810 = vpow2.f32 %v1527_v2  ;;  %v1093_v19 = vadd.f32 1.0, %v1795_v61  ;;  %v620_v2 = vld [vmem:[%s2012_s27 + $0xc0] sm:$0xff] }
 0x1c6   : > { %v995_v0 = vadd.f32 %v994_v48, %v881_v59  ;;  %1812 = vrcp.f32 %v1088_v57  ;;  %v1047_v16 = vadd.f32 %v993_v6, %v612_v9  ;;  %v1529_v24 = vmul.f32 -1.442695, %v1046_v63 }
 0x1c7   : > { %v883_v11 = vpop.f32.mrf.mxu0  ;;  %v1002_v21 = vpop.f32.mrf.mxu1  ;;  %1814 = vrcp.f32 %v1089_v5 }
 0x1c8   : > { %v1797_v14 = vpop.eup %1796  ;;  %v997_v18 = vadd.f32 %v996_v54, %v883_v11  ;;  %1816 = vrcp.f32 %v1090_v3  ;;  %v1048_v25 = vadd.f32 %v995_v0, %v613_v8  ;;  %v1530_v32 = vmul.f32 -1.442695, %v1047_v16  ;;  %v618_v11 = vld [vmem:[%s2012_s27 + $0xb0] sm:$0xff] }
 0x1c9   : > { %v885_v12 = vpop.f32.mrf.mxu0  ;;  %v1004_v13 = vpop.f32.mrf.mxu1  ;;  %1818 = vpow2.f32 %v1528_v62  ;;  %v1135_v27 = vadd.f32 1.0, %v1797_v14 }
 0x1ca   : > { %v1799_v23 = vpop.eup %1798  ;;  %v999_v26 = vadd.f32 %v998_v60, %v885_v12  ;;  %1820 = vrcp.f32 %v1091_v4  ;;  %v1049_v33 = vadd.f32 %v997_v18, %v614_v20  ;;  %v1531_v39 = vmul.f32 -1.442695, %v1048_v25  ;;  %v622_v4 = vld [vmem:[%s2012_s27 + $0xd0] sm:$0xff] }
 0x1cb   : > { %v889_v22 = vpop.f32.mrf.mxu0  ;;  %v1006_v17 = vpop.f32.mrf.mxu1  ;;  %1822 = vrcp.f32 %v1092_v15  ;;  %v1136_v34 = vadd.f32 1.0, %v1799_v23 }
 0x1cc   : > { %v1801_v31 = vpop.eup %1800  ;;  %v1003_v41 = vadd.f32 %v1002_v21, %v889_v22  ;;  %1824 = vrcp.f32 %v1093_v19  ;;  %v1050_v45 = vadd.f32 %v999_v26, %v615_v28  ;;  %v1532_v47 = vmul.f32 -1.442695, %v1049_v33  ;;  %v623_v22 = vld [vmem:[%s2012_s27 + $0xd8] sm:$0xff] }
 0x1cd   : > { %v891_v29 = vpop.f32.mrf.mxu0  ;;  %v2330_v30 = vpop.f32.mrf.mxu1  ;;  %1826 = vpow2.f32 %v1529_v24  ;;  %v1137_v40 = vadd.f32 1.0, %v1801_v31  ;;  %v619_v24 = vld [vmem:[%s2012_s27 + $0xb8] sm:$0xff] }
 0x1ce   : > { %v1803_v38 = vpop.eup %1802  ;;  %1828 = vrcp.f32 %v1135_v27  ;;  %v1005_v42 = vadd.f32 %v1004_v13, %v891_v29  ;;  %v1051_v48 = vadd.f32 %v1003_v41, %v616_v35  ;;  %v1533_v55 = vmul.f32 -1.442695, %v1050_v45  ;;  %v624_v29 = vld [vmem:[%s2012_s27 + $0xe0] sm:$0xff] }
 0x1cf   : > { %v893_v36 = vpop.f32.mrf.mxu0  ;;  %v1012_v37 = vpop.f32.mrf.mxu1  ;;  %1830 = vpow2.f32 %v1530_v32  ;;  %v1138_v51 = vadd.f32 1.0, %v1803_v38 }
 0x1d0   : > { %v1805_v46 = vpop.eup %1804  ;;  %1832 = vrcp.f32 %v1136_v34  ;;  %v1052_v58 = vadd.f32 %v1005_v42, %v617_v49  ;;  %v1534_v5 = vmul.f32 -1.442695, %v1051_v48  ;;  %v1007_v6 = vadd.f32 %v1006_v17, %v893_v36 }
 0x1d1   : > { %v895_v43 = vpop.f32.mrf.mxu0  ;;  %v1014_v44 = vpop.f32.mrf.mxu1  ;;  %1834 = vpow2.f32 %v1531_v39  ;;  %v1139_v57 = vadd.f32 1.0, %v1805_v46 }
 0x1d2   : > { %v2334_v50 = vpop.eup %1806  ;;  %1836 = vrcp.f32 %v1137_v40  ;;  %v1535_v13 = vmul.f32 -1.442695, %v1052_v58  ;;  %v1053_v19 = vadd.f32 %v1007_v6, %v618_v11  ;;  %v1009_v20 = vadd.f32 %v2330_v30, %v895_v43  ;;  %v1215_v6 = vld [vmem:[#allocation3] sm:$0xff] }
 0x1d3   : > { %v899_v52 = vpop.f32.mrf.mxu0  ;;  %v1016_v53 = vpop.f32.mrf.mxu1  ;;  %1838 = vpow2.f32 %v1532_v47  ;;  %v1094_v58 = vadd.f32 1.0, %v2334_v50 }
 0x1d4   : > { %v2336_v54 = vpop.eup %1808  ;;  %v1013_v7 = vadd.f32 %v1012_v37, %v899_v52  ;;  %1840 = vrcp.f32 %v1138_v51  ;;  %v1536_v35 = vmul.f32 -1.442695, %v1053_v19  ;;  %v1054_v36 = vadd.f32 %v1009_v20, %v619_v24  ;;  %v625_v37 = vld [vmem:[%s2012_s27 + $0xe8] sm:$0xff]  ;;  %v1218_v20 = vld [vmem:[#allocation3 + $0x20] sm:$0xff] }
 0x1d5   : > { %v1811_v56 = vpop.eup %1810  ;;  %v901_v59 = vpop.f32.mrf.mxu0  ;;  %1842 = vpow2.f32 %v1533_v55  ;;  %v627_v55 = vld [vmem:[%s2012_s27 + $0xf8] sm:$0xff] }
 0x1d6   : > { %v1018_v60 = vpop.f32.mrf.mxu1  ;;  %v2339_v1 = vpop.eup %1812  ;;  %v1015_v3 = vadd.f32 %v1014_v44, %v901_v59  ;;  %v1055_v21 = vadd.f32 %v1013_v7, %v620_v2  ;;  %v1140_v0 = vadd.f32 1.0, %v1811_v56  ;;  %1844 = vrcp.f32 %v1139_v57  ;;  %v626_v44 = vld [vmem:[%s2012_s27 + $0xf0] sm:$0xff] }
 0x1d7   : > { %v2342_v9 = vpop.eup %1814  ;;  %v903_v61 = vpop.f32.mrf.mxu0  ;;  %1846 = vpow2.f32 %v1534_v5 }
 0x1d8   : > { %v1022_v62 = vpop.f32.mrf.mxu1  ;;  %v2345_v63 = vpop.eup %1816  ;;  %v1017_v8 = vadd.f32 %v1016_v53, %v903_v61  ;;  %v1056_v14 = vadd.f32 %v1015_v3, %v621_v10  ;;  %1848 = vtanh.f32 %v1055_v21  ;;  %v1537_v53 = vmul.f32 -1.442695, %v1054_v36  ;;  %v1216_v21 = vld [vmem:[#allocation3 + $0x18] sm:$0xff] }
 0x1d9   : > { %v1819_v12 = vpop.eup %1818  ;;  %v905_v15 = vpop.f32.mrf.mxu0  ;;  %1850 = vrcp.f32 %v1140_v0 }
 0x1da   : > { %v1024_v16 = vpop.f32.mrf.mxu1  ;;  %v2348_v18 = vpop.eup %1820  ;;  %v1019_v17 = vadd.f32 %v1018_v60, %v905_v15  ;;  %v1057_v25 = vadd.f32 %v1017_v8, %v622_v4  ;;  %v1141_v28 = vadd.f32 1.0, %v1819_v12  ;;  %1852 = vtanh.f32 %v1056_v14  ;;  %v1217_v8 = vld [vmem:[#allocation3 + $0x10] sm:$0xff] }
 0x1db   : > { %v2352_v23 = vpop.eup %1822  ;;  %v909_v26 = vpop.f32.mrf.mxu0  ;;  %1854 = vpow2.f32 %v1535_v13 }
 0x1dc   : > { %v2355_v27 = vpop.eup %1824  ;;  %v1023_v31 = vadd.f32 %v1022_v62, %v909_v26  ;;  %v1058_v33 = vadd.f32 %v1019_v17, %v623_v22  ;;  %v1026_v30 = vpop.f32.mrf.mxu1  ;;  %1856 = vtanh.f32 %v1057_v25 }
 0x1dd   : > { %v1827_v32 = vpop.eup %1826  ;;  %v911_v41 = vpop.f32.mrf.mxu0  ;;  %1858 = vrcp.f32 %v1141_v28  ;;  %v1219_v28 = vld [vmem:[#allocation3 + $0x28] sm:$0xff] }
 0x1de   : > { %v1829_v34 = vpop.eup %1828  ;;  %v1025_v38 = vadd.f32 %v1024_v16, %v911_v41  ;;  %v1059_v45 = vadd.f32 %v1023_v31, %v624_v29  ;;  %v1142_v43 = vadd.f32 1.0, %v1827_v32  ;;  %1860 = vtanh.f32 %v1058_v33  ;;  %v1028_v49 = vpop.f32.mrf.mxu1  ;;  %v1220_v41 = vld [vmem:[#allocation3 + $0x8] sm:$0xff] }
 0x1df   : > { %v1831_v39 = vpop.eup %1830  ;;  %v913_v40 = vpop.f32.mrf.mxu0  ;;  %1862 = vpow2.f32 %v1536_v35  ;;  %v1223_v62 = vmul.f32 %v1829_v34, %v1215_v6 }
 0x1e0   : > { %v1833_v42 = vpop.eup %1832  ;;  %v1027_v46 = vadd.f32 %v1026_v30, %v913_v40  ;;  %v1060_v48 = vadd.f32 %v1025_v38, %v625_v37  ;;  %1864 = vtanh.f32 %v1059_v45  ;;  %v1183_v11 = vadd.f32 1.0, %v1831_v39  ;;  %v1221_v39 = vld [vmem:[#allocation3 + $0x30] sm:$0xff] }
 0x1e1   : > { %v1835_v47 = vpop.eup %1834  ;;  %v915_v51 = vpop.f32.mrf.mxu0  ;;  %1866 = vrcp.f32 %v1142_v43  ;;  %v1224_v14 = vmul.f32 %v1833_v42, %v1216_v21 }
 0x1e2   : > { %v1837_v52 = vpop.eup %1836  ;;  %v1029_v2 = vadd.f32 %v1028_v49, %v915_v51  ;;  %v1061_v56 = vadd.f32 %v1027_v46, %v626_v44  ;;  %1868 = vtanh.f32 %v1060_v48  ;;  %v1184_v50 = vadd.f32 1.0, %v1835_v47  ;;  %v1222_v46 = vld [vmem:[#allocation3 + $0x38] sm:$0xff] }
 0x1e3   : > { %v1839_v7 = vpop.eup %1838  ;;  %1870 = vpow2.f32 %v1537_v53  ;;  %v1225_v24 = vmul.f32 %v1837_v52, %v1217_v8 }
 0x1e4   : > { %v1841_v57 = vpop.eup %1840  ;;  %v1062_v60 = vadd.f32 %v1029_v2, %v627_v55  ;;  %1872 = vtanh.f32 %v1061_v56  ;;  %v1185_v19 = vadd.f32 1.0, %v1839_v7 }
 0x1e5   : > { %v1843_v59 = vpop.eup %1842  ;;  %1874 = vrcp.f32 %v1094_v58 }
 0x1e6   : > { %v1845_v5 = vpop.eup %1844  ;;  %1876 = vtanh.f32 %v1062_v60  ;;  %v1186_v26 = vadd.f32 1.0, %v1843_v59 }
 0x1e7   : > { %v1847_v10 = vpop.eup %1846  ;;  %1878 = vrcp.f32 %v1183_v11 }
 0x1e8   : > { %v1849_v3 = vpop.eup %1848  ;;  %v1187_v30 = vadd.f32 1.0, %v1847_v10 }
 0x1e9   : > { %v1851_v61 = vpop.eup %1850  ;;  %v1231_v0 = vmul.f32 %v1849_v3, %v2336_v54 }
 0x1ea   : > { %v1853_v4 = vpop.eup %1852 }
 0x1eb   : > { %v1855_v12 = vpop.eup %1854  ;;  %v1239_v13 = vadd.f32 %v1231_v0, %v1223_v62  ;;  %v1232_v15 = vmul.f32 %v1853_v4, %v2339_v1  ;;  %v1226_v1 = vmul.f32 %v1841_v57, %v1218_v20 }
 0x1ec   : > { %v1857_v16 = vpop.eup %1856  ;;  %v1188_v38 = vadd.f32 1.0, %v1855_v12 }
 0x1ed   : > { %v1859_v22 = vpop.eup %1858  ;;  %1880 = vtanh.f32 %v1239_v13  ;;  %1263 = vst [vmem:[#allocation3] sm:$0xff] %v1239_v13  ;;  %v1240_v17 = vadd.f32 %v1232_v15, %v1224_v14  ;;  %v1233_v54 = vmul.f32 %v1857_v16, %v2342_v9  ;;  %v1227_v9 = vmul.f32 %v1845_v5, %v1219_v28 }
 0x1ee   : > { %v1861_v25 = vpop.eup %1860  ;;  %1882 = vrcp.f32 %v1184_v50 }
 0x1ef   : > { %v1863_v29 = vpop.eup %1862  ;;  %1884 = vtanh.f32 %v1240_v17  ;;  %1264 = vst [vmem:[#allocation3 + $0x18] sm:$0xff] %v1240_v17  ;;  %v1241_v31 = vadd.f32 %v1233_v54, %v1225_v24  ;;  %v1234_v32 = vmul.f32 %v1861_v25, %v2345_v63  ;;  %v1228_v63 = vmul.f32 %v1851_v61, %v1220_v41 }
 0x1f0   : > { %v1865_v33 = vpop.eup %1864  ;;  %1886 = vrcp.f32 %v1185_v19  ;;  %v1189_v44 = vadd.f32 1.0, %v1863_v29 }
 0x1f1   : > { %v1867_v34 = vpop.eup %1866  ;;  %1888 = vtanh.f32 %v1241_v31  ;;  %1265 = vst [vmem:[#allocation3 + $0x10] sm:$0xff] %v1241_v31  ;;  %v1242_v35 = vadd.f32 %v1234_v32, %v1226_v1  ;;  %v1235_v36 = vmul.f32 %v1865_v33, %v2348_v18  ;;  %v1229_v18 = vmul.f32 %v1859_v22, %v1221_v39 }
 0x1f2   : > { %v1869_v37 = vpop.eup %1868  ;;  %1890 = vrcp.f32 %v1186_v26  ;;  %v1230_v55 = vmul.f32 %v1867_v34, %v1222_v46 }
 0x1f3   : > { %v1871_v45 = vpop.eup %1870  ;;  %1892 = vtanh.f32 %v1242_v35  ;;  %1266 = vst [vmem:[#allocation3 + $0x20] sm:$0xff] %v1242_v35  ;;  %v1243_v40 = vadd.f32 %v1235_v36, %v1227_v9  ;;  %v1236_v42 = vmul.f32 %v1869_v37, %v2352_v23 }
 0x1f4   : > { %v1873_v43 = vpop.eup %1872  ;;  %1894 = vrcp.f32 %v1187_v30  ;;  %v1190_v52 = vadd.f32 1.0, %v1871_v45 }
 0x1f5   : > { %v1875_v47 = vpop.eup %1874  ;;  %1896 = vtanh.f32 %v1243_v40  ;;  %1267 = vst [vmem:[#allocation3 + $0x28] sm:$0xff] %v1243_v40  ;;  %v1244_v48 = vadd.f32 %v1236_v42, %v1228_v63  ;;  %v1237_v49 = vmul.f32 %v1873_v43, %v2355_v27 }
 0x1f6   : > { %v1877_v51 = vpop.eup %1876  ;;  %1898 = vrcp.f32 %v1188_v38 }
 0x1f7   : > { %1900 = vtanh.f32 %v1244_v48  ;;  %1268 = vst [vmem:[#allocation3 + $0x8] sm:$0xff] %v1244_v48  ;;  %v1245_v53 = vadd.f32 %v1237_v49, %v1229_v18  ;;  %v1238_v23 = vmul.f32 %v1877_v51, %v1875_v47  ;;  %v1879_v2 = vpop.eup %1878 }
 0x1f8   : > { %1902 = vrcp.f32 %v1189_v44 }
 0x1f9   : > { %1904 = vtanh.f32 %v1245_v53  ;;  %1269 = vst [vmem:[#allocation3 + $0x30] sm:$0xff] %v1245_v53  ;;  %v1246_v7 = vadd.f32 %v1238_v23, %v1230_v55 }
 0x1fa   : > { %v1881_v56 = vpop.eup %1880  ;;  %1906 = vrcp.f32 %v1190_v52 }
 0x1fb   : > { %v1883_v57 = vpop.eup %1882  ;;  %v1255_v58 = vmul.f32 %v1881_v56, %v1879_v2  ;;  %1908 = vtanh.f32 %v1246_v7  ;;  %1270 = vst [vmem:[#allocation3 + $0x38] sm:$0xff] %v1246_v7 }
 0x1fc   : > { %v1885_v27 = vpop.eup %1884 }
 0x1fd   : > { %v1887_v59 = vpop.eup %1886  ;;  %1271 = vst [vmem:[#allocation2 + $0x30] sm:$0xff] %v1255_v58  ;;  %1279 = vst [vmem:[%s2017_s30] sm:$0xff] %v1255_v58  ;;  %v1256_v60 = vmul.f32 %v1885_v27, %v1883_v57 }
 0x1fe   : > { %v1889_v5 = vpop.eup %1888 }
 0x1ff   : > { %v1891_v6 = vpop.eup %1890  ;;  %1272 = vst [vmem:[#allocation2] sm:$0xff] %v1256_v60  ;;  %1280 = vst [vmem:[%s2017_s30 + $0x8] sm:$0xff] %v1256_v60  ;;  %v1257_v10 = vmul.f32 %v1889_v5, %v1887_v59 }
 0x200   : > { %v1893_v3 = vpop.eup %1892 }
 0x201   : > { %v1895_v11 = vpop.eup %1894  ;;  %1273 = vst [vmem:[#allocation2 + $0x18] sm:$0xff] %v1257_v10  ;;  %1281 = vst [vmem:[%s2017_s30 + $0x10] sm:$0xff] %v1257_v10  ;;  %v1258_v21 = vmul.f32 %v1893_v3, %v1891_v6 }
 0x202   : > { %v1897_v61 = vpop.eup %1896 }
 0x203   : > { %v1899_v62 = vpop.eup %1898  ;;  %1274 = vst [vmem:[#allocation2 + $0x10] sm:$0xff] %v1258_v21  ;;  %1282 = vst [vmem:[%s2017_s30 + $0x18] sm:$0xff] %v1258_v21  ;;  %v1259_v0 = vmul.f32 %v1897_v61, %v1895_v11 }
 0x204   : > { %v1901_v4 = vpop.eup %1900 }
 0x205   : > { %v1903_v50 = vpop.eup %1902  ;;  %1275 = vst [vmem:[#allocation2 + $0x8] sm:$0xff] %v1259_v0  ;;  %1283 = vst [vmem:[%s2017_s30 + $0x20] sm:$0xff] %v1259_v0  ;;  %v1260_v8 = vmul.f32 %v1901_v4, %v1899_v62 }
 0x206   : > { %v1905_v12 = vpop.eup %1904 }
 0x207   : > { %v1907_v13 = vpop.eup %1906  ;;  %1276 = vst [vmem:[#allocation2 + $0x20] sm:$0xff] %v1260_v8  ;;  %1284 = vst [vmem:[%s2017_s30 + $0x28] sm:$0xff] %v1260_v8  ;;  %v1261_v14 = vmul.f32 %v1905_v12, %v1903_v50 }
 0x208   : > { %v1909_v15 = vpop.eup %1908 }
 0x209   : > { %1277 = vst [vmem:[#allocation2 + $0x28] sm:$0xff] %v1261_v14  ;;  %1285 = vst [vmem:[%s2017_s30 + $0x30] sm:$0xff] %v1261_v14  ;;  %v1262_v16 = vmul.f32 %v1909_v15, %v1907_v13 }
 0x20b   : > { %1278 = vst [vmem:[#allocation2 + $0x38] sm:$0xff] %v1262_v16  ;;  %1286 = vst [vmem:[%s2017_s30 + $0x38] sm:$0xff] %v1262_v16 }
 0x20c PF: > { %s12_s13 = sadd.s32 1, %s1948_s13   ;;  %s2411_s9 = smov %s1940_s11 }
 0x20d   : > { %p9_p8 = scmp.ge.s32.totalorder %s12_s13, 18   ;;  %s2412_s10 = smov %s1944_s12 }
 0x20e   : > { %s2413_s11 = smov %s2416_s14  ;;  %s2414_s12 = smov %s2420_s15 }
 0x20f   :  { %11 = sbr.rel (!%p9_p8) target bundleno = 3 (0x3), region = 62 }

</bundles_post_ra>
